<compile_context>
chip_gen: v7x
topology: tpu7x:2x2x1
jax: 0.10.0
libtpu: 0.0.40
codegen_flags: <defaults>
</compile_context>

<pallas_src>
import functools

import jax
import jax.numpy as jnp
from jax.experimental import pallas as pl
from jax.experimental.pallas import tpu as pltpu

_SUBLANE = 8  # f32 sublane granularity for tiled (multi-step) batch blocks


def _round_up(n, m):
    return ((n + m - 1) // m) * m


def _default_grid_steps():
    """2 parallel batch tiles on v7x (2 TensorCores/chip), else 1 big tile."""
    try:
        kind = jax.devices()[0].device_kind.lower()
    except Exception:  # pragma: no cover - defensive; default to single step
        return 1
    return 2 if "v7" in kind else 1


def _fused_mlp_kernel(x_ref, *refs, out_dims):
    """One batch tile through the whole MLP; intermediates stay on-chip.

    refs = (w_0, ..., w_{L-1}, b_all, o_ref)
      w_l   : (in_l, out_l) weights in compute dtype, VMEM-resident
      b_all : (L, max_out)  f32, row l holds layer l's bias (zero padded)
      o_ref : (tile_b, data_dim) f32 output tile
    """
    o_ref = refs[-1]
    b_ref = refs[-2]
    w_refs = refs[:-2]
    n_layers = len(w_refs)

    h = x_ref[...]                                   # (tile_b, in_dim), compute dtype
    for l in range(n_layers):                        # static unroll over layers
        w = w_refs[l][...]                           # (in_l, out_l)
        y = jnp.dot(h, w, preferred_element_type=jnp.float32)   # MXU, f32 accum
        y = y + b_ref[l:l + 1, :out_dims[l]]         # f32 bias add, (1, out) bcast
        if l < n_layers - 1:
            # ReLU in f32, then keep the activation in compute dtype (single
            # cast; a no-op when compute dtype is f32).
            h = jnp.maximum(y, 0.0).astype(w.dtype)
        else:
            o_ref[...] = y.astype(o_ref.dtype)       # final layer: no activation


def prepare_decoder_params(params, compute_dtype=jnp.float32):
    """One-time prep (hoisted out of the per-call path).

    params: list of (W, b) with W shaped (in_features, out_features).
    Returns (weights, b_all, out_dims) where biases of all layers are packed
    into a single (n_layers, max_out) f32 array.
    """
    w_list = tuple(jnp.asarray(w, compute_dtype) for w, _ in params)
    out_dims = tuple(int(w.shape[1]) for w, _ in params)
    max_out = max(out_dims)
    b_all = jnp.zeros((len(params), max_out), jnp.float32)
    for l, (_, b) in enumerate(params):
        b_all = b_all.at[l, : b.shape[0]].set(b.astype(jnp.float32))
    return w_list, b_all, out_dims


def decoder_forward(x, prepared, *, grid_steps=None):
    """Pallas implementation of Decoder.forward (output_info is unused there)."""
    w_list, b_all, out_dims = prepared
    batch, in_dim = x.shape
    assert in_dim == w_list[0].shape[0]
    data_dim = out_dims[-1]

    if grid_steps is None:
        grid_steps = _default_grid_steps()
    grid_steps = max(1, min(int(grid_steps), pl.cdiv(batch, _SUBLANE)))

    if grid_steps == 1:
        # Single step: block == full array, no alignment/padding needed.
        tile_b = batch
    else:
        tile_b = _round_up(pl.cdiv(batch, grid_steps), _SUBLANE)
    pad_batch = tile_b * grid_steps

    xp = x.astype(w_list[0].dtype)
    if pad_batch != batch:
        # Only awkward batch/step combinations pad a few rows; sliced off below.
        xp = jnp.pad(xp, ((0, pad_batch - batch), (0, 0)))

    in_specs = [pl.BlockSpec((tile_b, in_dim), lambda i: (i, 0))]
    for w in w_list:  # grid-invariant: full array, constant block index
        in_specs.append(pl.BlockSpec(w.shape, lambda i: (0, 0)))
    in_specs.append(pl.BlockSpec(b_all.shape, lambda i: (0, 0)))
    out_spec = pl.BlockSpec((tile_b, data_dim), lambda i: (i, 0))

    flops = 2 * pad_batch * sum(w.shape[0] * w.shape[1] for w in w_list)
    bytes_accessed = (
        xp.size * xp.dtype.itemsize
        + sum(w.size * w.dtype.itemsize for w in w_list)
        + b_all.size * b_all.dtype.itemsize
        + pad_batch * data_dim * 4)

    kernel = functools.partial(_fused_mlp_kernel, out_dims=out_dims)
    out = pl.pallas_call(
        kernel,
        out_shape=jax.ShapeDtypeStruct((pad_batch, data_dim), jnp.float32),
        grid=(grid_steps,),
        in_specs=in_specs,
        out_specs=out_spec,
        compiler_params=pltpu.CompilerParams(
            dimension_semantics=("parallel",)),  # v7x: shard batch over 2 TCs
        cost_estimate=pl.CostEstimate(
            flops=flops, transcendentals=0, bytes_accessed=bytes_accessed),
    )(xp, *w_list, b_all)

    if pad_batch != batch:
        out = out[:batch]
    return out


def init_decoder_params(key, embedding_dim, decompress_dims, data_dim,
                        dtype=jnp.float32):
    """PyTorch-Linear-style init: uniform(-1/sqrt(fan_in), 1/sqrt(fan_in)).

    Weights stored as (in_features, out_features) so the kernel does x @ W + b
    (equivalent to PyTorch's x @ W.T + b with W stored (out, in)).
    """
    dims = [embedding_dim] + list(decompress_dims) + [data_dim]
    params = []
    for i in range(len(dims) - 1):
        fan_in, fan_out = dims[i], dims[i + 1]
        key, kw, kb = jax.random.split(key, 3)
        bound = 1.0 / jnp.sqrt(jnp.asarray(fan_in, dtype))
        w = jax.random.uniform(kw, (fan_in, fan_out), dtype, -bound, bound)
        b = jax.random.uniform(kb, (fan_out,), dtype, -bound, bound)
        params.append((w, b))
    return params


if __name__ == "__main__":
    # Shapes consistent with the module; batch=512 gives 1 grid step on
    # v5e/v6e and 2 parallel steps (256 rows each) on v7x.
    batch = 512
    embedding_dim = 32
    decompress_dims = (64, 32)
    data_dim = 48

    key = jax.random.PRNGKey(0)
    key_x, key_p = jax.random.split(key)

    x = jax.random.normal(key_x, (batch, embedding_dim), dtype=jnp.float32)
    params = init_decoder_params(key_p, embedding_dim, decompress_dims, data_dim)

    # One-time parameter prep (hoisted out of the per-call path).
    prepared = prepare_decoder_params(params, compute_dtype=jnp.float32)

    out = jax.block_until_ready(decoder_forward(x, prepared))
    assert out.shape == (batch, data_dim), out.shape

    # Reference: the exact f32 PyTorch-equivalent forward (tight tolerance —
    # the kernel now uses f32 matmuls with f32 accumulation).
    ref = x
    for i, (w, b) in enumerate(params):
        ref = ref @ w + b
        if i != len(params) - 1:
            ref = jnp.maximum(ref, 0.0)
    max_err = float(jnp.max(jnp.abs(out - ref)))
    assert jnp.allclose(out, ref, atol=1e-4, rtol=1e-4), max_err

    print("KERNEL_OK")
</pallas_src>

<mosaic_0001>
module attributes {stable_mosaic.version = 11 : i64} {
  func.func @_fused_mlp_kernel(%arg0: i32, %arg1: memref<512x32xf32, #tpu.memory_space<vmem>>, %arg2: memref<32x64xf32, #tpu.memory_space<vmem>>, %arg3: memref<64x32xf32, #tpu.memory_space<vmem>>, %arg4: memref<32x48xf32, #tpu.memory_space<vmem>>, %arg5: memref<3x64xf32, #tpu.memory_space<vmem>>, %arg6: memref<512x48xf32, #tpu.memory_space<vmem>>) attributes {dimension_semantics = [#tpu.dimension_semantics<parallel>], iteration_bounds = array<i64: 1>, scalar_prefetch = 0 : i64, scratch_operands = 0 : i64, tpu.core_type = #tpu.core_type<tc>, window_params = [{transform_indices = @transform_0, window_bounds = array<i64: 512, 32>}, {pipeline_mode = #tpu.pipeline_mode<synchronous>, transform_indices = @transform_1, window_bounds = array<i64: 32, 64>}, {pipeline_mode = #tpu.pipeline_mode<synchronous>, transform_indices = @transform_2, window_bounds = array<i64: 64, 32>}, {pipeline_mode = #tpu.pipeline_mode<synchronous>, transform_indices = @transform_3, window_bounds = array<i64: 32, 48>}, {pipeline_mode = #tpu.pipeline_mode<synchronous>, transform_indices = @transform_4, window_bounds = array<i64: 3, 64>}, {transform_indices = @transform_5, window_bounds = array<i64: 512, 48>}]} {
    %c0 = arith.constant 0 : index
    %c0_0 = arith.constant 0 : index
    %0 = vector.load %arg1[%c0, %c0_0] : memref<512x32xf32, #tpu.memory_space<vmem>>, vector<512x32xf32>
    %c0_1 = arith.constant 0 : index
    %c0_2 = arith.constant 0 : index
    %1 = vector.load %arg2[%c0_1, %c0_2] : memref<32x64xf32, #tpu.memory_space<vmem>>, vector<32x64xf32>
    %cst = arith.constant dense<0.000000e+00> : vector<512x64xf32>
    %2 = tpu.matmul %0, %1, %cst {dimension_numbers = #tpu.dot_dimension_numbers<[1], [0], [0], [1], [0, 0, 1, 1], [], []>} : vector<512x32xf32>, vector<32x64xf32>, vector<512x64xf32> -> vector<512x64xf32>
    %c0_3 = arith.constant 0 : index
    %c0_4 = arith.constant 0 : index
    %3 = vector.load %arg5[%c0_3, %c0_4] : memref<3x64xf32, #tpu.memory_space<vmem>>, vector<1x64xf32>
    %4 = vector.broadcast %3 : vector<1x64xf32> to vector<512x64xf32>
    %5 = arith.addf %2, %4 : vector<512x64xf32>
    %cst_5 = arith.constant 0.000000e+00 : f32
    %6 = vector.broadcast %cst_5 : f32 to vector<512x64xf32>
    %7 = arith.maximumf %5, %6 : vector<512x64xf32>
    %c0_6 = arith.constant 0 : index
    %c0_7 = arith.constant 0 : index
    %8 = vector.load %arg3[%c0_6, %c0_7] : memref<64x32xf32, #tpu.memory_space<vmem>>, vector<64x32xf32>
    %cst_8 = arith.constant dense<0.000000e+00> : vector<512x32xf32>
    %9 = tpu.matmul %7, %8, %cst_8 {dimension_numbers = #tpu.dot_dimension_numbers<[1], [0], [0], [1], [0, 0, 1, 1], [], []>} : vector<512x64xf32>, vector<64x32xf32>, vector<512x32xf32> -> vector<512x32xf32>
    %c1 = arith.constant 1 : index
    %c0_9 = arith.constant 0 : index
    %10 = vector.load %arg5[%c1, %c0_9] : memref<3x64xf32, #tpu.memory_space<vmem>>, vector<1x32xf32>
    %11 = vector.broadcast %10 : vector<1x32xf32> to vector<512x32xf32>
    %12 = arith.addf %9, %11 : vector<512x32xf32>
    %cst_10 = arith.constant 0.000000e+00 : f32
    %13 = vector.broadcast %cst_10 : f32 to vector<512x32xf32>
    %14 = arith.maximumf %12, %13 : vector<512x32xf32>
    %c0_11 = arith.constant 0 : index
    %c0_12 = arith.constant 0 : index
    %15 = vector.load %arg4[%c0_11, %c0_12] : memref<32x48xf32, #tpu.memory_space<vmem>>, vector<32x48xf32>
    %cst_13 = arith.constant dense<0.000000e+00> : vector<512x48xf32>
    %16 = tpu.matmul %14, %15, %cst_13 {dimension_numbers = #tpu.dot_dimension_numbers<[1], [0], [0], [1], [0, 0, 1, 1], [], []>} : vector<512x32xf32>, vector<32x48xf32>, vector<512x48xf32> -> vector<512x48xf32>
    %c2 = arith.constant 2 : index
    %c0_14 = arith.constant 0 : index
    %17 = vector.load %arg5[%c2, %c0_14] : memref<3x64xf32, #tpu.memory_space<vmem>>, vector<1x48xf32>
    %18 = vector.broadcast %17 : vector<1x48xf32> to vector<512x48xf32>
    %19 = arith.addf %16, %18 : vector<512x48xf32>
    %c0_15 = arith.constant 0 : index
    %c0_16 = arith.constant 0 : index
    %20 = vector.load %arg6[%c0_15, %c0_16] : memref<512x48xf32, #tpu.memory_space<vmem>>, vector<512x48xf32>
    tpu.vector_store %arg6[%c0_15, %c0_16], %19 {strides = array<i32>} : memref<512x48xf32, #tpu.memory_space<vmem>>, vector<512x48xf32>,
    return
  }
  func.func @transform_0(%arg0: i32) -> (i32, i32) {
    %c0_i32 = arith.constant 0 : i32
    %c0_i32_0 = arith.constant 0 : i32
    return %arg0, %c0_i32 : i32, i32
  }
  func.func @transform_1(%arg0: i32) -> (i32, i32) {
    %c0_i32 = arith.constant 0 : i32
    %c0_i32_0 = arith.constant 0 : i32
    %c0_i32_1 = arith.constant 0 : i32
    return %c0_i32, %c0_i32_0 : i32, i32
  }
  func.func @transform_2(%arg0: i32) -> (i32, i32) {
    %c0_i32 = arith.constant 0 : i32
    %c0_i32_0 = arith.constant 0 : i32
    %c0_i32_1 = arith.constant 0 : i32
    return %c0_i32, %c0_i32_0 : i32, i32
  }
  func.func @transform_3(%arg0: i32) -> (i32, i32) {
    %c0_i32 = arith.constant 0 : i32
    %c0_i32_0 = arith.constant 0 : i32
    %c0_i32_1 = arith.constant 0 : i32
    return %c0_i32, %c0_i32_0 : i32, i32
  }
  func.func @transform_4(%arg0: i32) -> (i32, i32) {
    %c0_i32 = arith.constant 0 : i32
    %c0_i32_0 = arith.constant 0 : i32
    %c0_i32_1 = arith.constant 0 : i32
    return %c0_i32, %c0_i32_0 : i32, i32
  }
  func.func @transform_5(%arg0: i32) -> (i32, i32) {
    %c0_i32 = arith.constant 0 : i32
    %c0_i32_0 = arith.constant 0 : i32
    return %arg0, %c0_i32 : i32, i32
  }
}

</mosaic_0001>

<bundles_post_ra>
// kernel: tpu_custom_call.1
= control target key start
LH: loop header
LB: loop body
LE: loop exit
PB: predicated region body
PF: predicated region fallthrough
CT: control target
= control target key end

     0   :  { %vm93_vm0 = vcmask 261120   ;;  %vm748_vm1 = vcmask 523264   ;;  %vm1976_vm2 = vcmask 392192   ;;  %s3825_s1 = inlined_call_operand.vmem [shape: f32[32,64], index: 1, kind: input, shape index: {}]   ;;  %s3826_s0 = inlined_call_operand.vmem [shape: f32[512,32], index: 0, kind: input, shape index: {}]   ;;  %s3827_s2 = inlined_call_operand.vmem [shape: f32[64,32], index: 2, kind: input, shape index: {}]   ;;  %s3828_s4 = inlined_call_operand.vmem [shape: f32[3,64], index: 4, kind: input, shape index: {}]   ;;  %s3829_s3 = inlined_call_operand.vmem [shape: f32[32,48], index: 3, kind: input, shape index: {}]   ;;  %s3830_s5 = inlined_call_operand.vmem [shape: f32[512,48], index: 5, kind: output, shape index: {}]  }
   0x1   :  { %v84_v0 = vld [vmem:[%s3825_s1] sm:$0xff]  ;;  %v85_v1 = vld [vmem:[%s3825_s1 + $0x8] sm:$0xff]  ;;  %v86_v2 = vld [vmem:[%s3825_s1 + $0x10] sm:$0xff] }
   0x2   :  { %v2768_v3 = vpack.c.bf16 %v85_v1, %v84_v0  ;;  %v87_v4 = vld [vmem:[%s3825_s1 + $0x18] sm:$0xff]  ;;  %v20_v5 = vld [vmem:[%s3826_s0] sm:$0xff]  ;;  %v21_v7 = vld [vmem:[%s3826_s0 + $0x8] sm:$0xff] }
   0x3   :  { %v2772_v6 = vpack.c.bf16 %v87_v4, %v86_v2  ;;  %2456 = vmatprep.mubr.msk.f32.mxu0 %vm93_vm0, %v20_v5  ;;  %v22_v8 = vld [vmem:[%s3826_s0 + $0x10] sm:$0xff]  ;;  %v23_v9 = vld [vmem:[%s3826_s0 + $0x18] sm:$0xff]  ;;  %v52_v10 = vld [vmem:[%s3826_s0 + $0x100] sm:$0xff] }
   0x4   :  { %2769 = vmatprep.subr.bf16.mxu0 %v2768_v3  ;;  %2800 = vmatprep.subr.bf16.mxu1 %v2768_v3  ;;  %v53_v11 = vld [vmem:[%s3826_s0 + $0x108] sm:$0xff]  ;;  %v54_v12 = vld [vmem:[%s3826_s0 + $0x110] sm:$0xff]  ;;  %v24_v13 = vld [vmem:[%s3826_s0 + $0x20] sm:$0xff] }
   0x5   :  { %2771 = vmatpush3.bf16.msra.mxu0 %v2768_v3  ;;  %2802 = vmatpush3.bf16.msra.mxu1 %v2768_v3  ;;  %v55_v14 = vld [vmem:[%s3826_s0 + $0x118] sm:$0xff]  ;;  %v25_v15 = vld [vmem:[%s3826_s0 + $0x28] sm:$0xff]  ;;  %v56_v16 = vld [vmem:[%s3826_s0 + $0x120] sm:$0xff] }
   0x6   :  { %2773 = vmatprep.subr.bf16.mxu0 %v2772_v6  ;;  %2801 = vmatprep.subr.bf16.mxu1 %v2772_v6  ;;  %v26_v17 = vld [vmem:[%s3826_s0 + $0x30] sm:$0xff]  ;;  %v57_v18 = vld [vmem:[%s3826_s0 + $0x128] sm:$0xff]  ;;  %v27_v19 = vld [vmem:[%s3826_s0 + $0x38] sm:$0xff] }
   0x7   :  { %2504 = vmatprep.mubr.msk.f32.mxu1 %vm93_vm0, %v52_v10  ;;  %v58_v20 = vld [vmem:[%s3826_s0 + $0x130] sm:$0xff]  ;;  %v28_v21 = vld [vmem:[%s3826_s0 + $0x40] sm:$0xff]  ;;  %v59_v22 = vld [vmem:[%s3826_s0 + $0x138] sm:$0xff] }
   0x8   :  { %v735_v23 = vld [vmem:[%s3827_s2] sm:$0xff]  ;;  %v736_v24 = vld [vmem:[%s3827_s2 + $0x8] sm:$0xff]  ;;  %v737_v25 = vld [vmem:[%s3827_s2 + $0x10] sm:$0xff] }
   0x9   :  { %2775 = vmatpush3.bf16.msra.mxu0 %v2772_v6  ;;  %2803 = vmatpush3.bf16.msra.mxu1 %v2772_v6  ;;  %v738_v26 = vld [vmem:[%s3827_s2 + $0x18] sm:$0xff]  ;;  %v29_v27 = vld [vmem:[%s3826_s0 + $0x48] sm:$0xff]  ;;  %v60_v28 = vld [vmem:[%s3826_s0 + $0x140] sm:$0xff]  ;;  %v2776_v29 = vpack.c.bf16 %v736_v24, %v735_v23 }
   0xa   :  { %v30_v30 = vld [vmem:[%s3826_s0 + $0x50] sm:$0xff]  ;;  %v2780_v31 = vpack.c.bf16 %v738_v26, %v737_v25  ;;  %v739_v32 = vld [vmem:[%s3827_s2 + $0x20] sm:$0xff]  ;;  %v740_v33 = vld [vmem:[%s3827_s2 + $0x28] sm:$0xff] }
   0xb   :  { %2777 = vmatprep.subr.bf16.mxu1 %v2776_v29  ;;  %v61_v34 = vld [vmem:[%s3826_s0 + $0x148] sm:$0xff]  ;;  %v31_v35 = vld [vmem:[%s3826_s0 + $0x58] sm:$0xff]  ;;  %v62_v36 = vld [vmem:[%s3826_s0 + $0x150] sm:$0xff]  ;;  %v2784_v38 = vpack.c.bf16 %v740_v33, %v739_v32 }
   0xc   :  { %2457 = vmatmul.mubr.msk.f32.vlgmr.msra.gmra.mrb[0].mxu0 %vm93_vm0, %v21_v7  ;;  %2505 = vmatmul.mubr.msk.f32.vlgmr.msra.gmra.mrb[0].mxu1 %vm93_vm0, %v53_v11  ;;  %v32_v37 = vld [vmem:[%s3826_s0 + $0x60] sm:$0xff]  ;;  %v741_v39 = vld [vmem:[%s3827_s2 + $0x30] sm:$0xff]  ;;  %v742_v40 = vld [vmem:[%s3827_s2 + $0x38] sm:$0xff] }
   0xd   :  { %2459 = vmatprep.mubr.msk.f32.mxu0 %vm93_vm0, %v22_v8  ;;  %2507 = vmatprep.mubr.msk.f32.mxu1 %vm93_vm0, %v54_v12  ;;  %v63_v41 = vld [vmem:[%s3826_s0 + $0x158] sm:$0xff]  ;;  %v33_v42 = vld [vmem:[%s3826_s0 + $0x68] sm:$0xff]  ;;  %v64_v43 = vld [vmem:[%s3826_s0 + $0x160] sm:$0xff]  ;;  %v2788_v45 = vpack.c.bf16 %v742_v40, %v741_v39 }
   0xe   :  { %2779 = vmatpush3.bf16.msra.mxu1 %v2776_v29  ;;  %v34_v44 = vld [vmem:[%s3826_s0 + $0x70] sm:$0xff]  ;;  %v65_v46 = vld [vmem:[%s3826_s0 + $0x168] sm:$0xff]  ;;  %v35_v47 = vld [vmem:[%s3826_s0 + $0x78] sm:$0xff] }
   0xf   :  { %2781 = vmatprep.subr.bf16.mxu1 %v2780_v31  ;;  %v66_v48 = vld [vmem:[%s3826_s0 + $0x170] sm:$0xff]  ;;  %v36_v49 = vld [vmem:[%s3826_s0 + $0x80] sm:$0xff]  ;;  %v67_v50 = vld [vmem:[%s3826_s0 + $0x178] sm:$0xff] }
  0x10   :  { %2460 = vmatmul.mubr.msk.f32.gmra.mrb[2].mxu0 %vm93_vm0, %v23_v9  ;;  %2508 = vmatmul.mubr.msk.f32.gmra.mrb[2].mxu1 %vm93_vm0, %v55_v14  ;;  %v37_v51 = vld [vmem:[%s3826_s0 + $0x88] sm:$0xff]  ;;  %v68_v52 = vld [vmem:[%s3826_s0 + $0x180] sm:$0xff]  ;;  %v38_v53 = vld [vmem:[%s3826_s0 + $0x90] sm:$0xff] }
  0x11   :  { %2462 = vmatprep.mubr.msk.f32.mxu0 %vm93_vm0, %v24_v13  ;;  %2510 = vmatprep.mubr.msk.f32.mxu1 %vm93_vm0, %v56_v16  ;;  %v69_v54 = vld [vmem:[%s3826_s0 + $0x188] sm:$0xff]  ;;  %v39_v55 = vld [vmem:[%s3826_s0 + $0x98] sm:$0xff]  ;;  %v70_v56 = vld [vmem:[%s3826_s0 + $0x190] sm:$0xff] }
  0x12   :  { %2783 = vmatpush3.bf16.msra.mxu1 %v2780_v31  ;;  %v40_v57 = vld [vmem:[%s3826_s0 + $0xa0] sm:$0xff]  ;;  %v71_v58 = vld [vmem:[%s3826_s0 + $0x198] sm:$0xff]  ;;  %v41_v59 = vld [vmem:[%s3826_s0 + $0xa8] sm:$0xff] }
  0x13   :  { %2785 = vmatprep.subr.bf16.mxu1 %v2784_v38  ;;  %v72_v60 = vld [vmem:[%s3826_s0 + $0x1a0] sm:$0xff]  ;;  %v42_v61 = vld [vmem:[%s3826_s0 + $0xb0] sm:$0xff]  ;;  %v73_v62 = vld [vmem:[%s3826_s0 + $0x1a8] sm:$0xff] }
  0x14   :  { %2463 = vmatmul.mubr.msk.f32.gmra.mrb[4].mxu0 %vm93_vm0, %v25_v15  ;;  %2511 = vmatmul.mubr.msk.f32.gmra.mrb[4].mxu1 %vm93_vm0, %v57_v18  ;;  %v43_v63 = vld [vmem:[%s3826_s0 + $0xb8] sm:$0xff]  ;;  %v74_v0 = vld [vmem:[%s3826_s0 + $0x1b0] sm:$0xff]  ;;  %v44_v1 = vld [vmem:[%s3826_s0 + $0xc0] sm:$0xff] }
  0x15   :  { %2465 = vmatprep.mubr.msk.f32.mxu0 %vm93_vm0, %v26_v17  ;;  %2513 = vmatprep.mubr.msk.f32.mxu1 %vm93_vm0, %v58_v20  ;;  %v75_v2 = vld [vmem:[%s3826_s0 + $0x1b8] sm:$0xff]  ;;  %v45_v3 = vld [vmem:[%s3826_s0 + $0xc8] sm:$0xff]  ;;  %v76_v4 = vld [vmem:[%s3826_s0 + $0x1c0] sm:$0xff] }
  0x16   :  { %2787 = vmatpush3.bf16.msra.mxu1 %v2784_v38  ;;  %v46_v5 = vld [vmem:[%s3826_s0 + $0xd0] sm:$0xff]  ;;  %v77_v6 = vld [vmem:[%s3826_s0 + $0x1c8] sm:$0xff]  ;;  %v47_v7 = vld [vmem:[%s3826_s0 + $0xd8] sm:$0xff] }
  0x17   :  { %2789 = vmatprep.subr.bf16.mxu1 %v2788_v45  ;;  %v78_v8 = vld [vmem:[%s3826_s0 + $0x1d0] sm:$0xff]  ;;  %v48_v9 = vld [vmem:[%s3826_s0 + $0xe0] sm:$0xff]  ;;  %v79_v10 = vld [vmem:[%s3826_s0 + $0x1d8] sm:$0xff] }
  0x18   :  { %2466 = vmatmul.mubr.msk.f32.gmra.mrb[6].mxu0 %vm93_vm0, %v27_v19  ;;  %2514 = vmatmul.mubr.msk.f32.gmra.mrb[6].mxu1 %vm93_vm0, %v59_v22  ;;  %v49_v11 = vld [vmem:[%s3826_s0 + $0xe8] sm:$0xff]  ;;  %v80_v12 = vld [vmem:[%s3826_s0 + $0x1e0] sm:$0xff]  ;;  %v50_v13 = vld [vmem:[%s3826_s0 + $0xf0] sm:$0xff] }
  0x19   :  { %2468 = vmatprep.mubr.msk.f32.mxu0 %vm93_vm0, %v28_v21  ;;  %2516 = vmatprep.mubr.msk.f32.mxu1 %vm93_vm0, %v60_v28  ;;  %v81_v14 = vld [vmem:[%s3826_s0 + $0x1e8] sm:$0xff]  ;;  %v51_v15 = vld [vmem:[%s3826_s0 + $0xf8] sm:$0xff]  ;;  %v82_v16 = vld [vmem:[%s3826_s0 + $0x1f0] sm:$0xff] }
  0x1a   :  { %2791 = vmatpush3.bf16.msra.mxu1 %v2788_v45  ;;  %v83_v17 = vld [vmem:[%s3826_s0 + $0x1f8] sm:$0xff]  ;;  %v3129_v18 = vld [vmem:[%s3828_s4] ss:$0 sm:$0xff]  ;;  %v1391_v29 = vld [vmem:[%s3829_s3 + $0x8] sm:$0xff] }
  0x1b   :  { %v1390_v28 = vld [vmem:[%s3829_s3] sm:$0xff] }
  0x1c   :  { %2469 = vmatmul.mubr.msk.f32.gmra.mrb[8].mxu0 %vm93_vm0, %v29_v27  ;;  %2517 = vmatmul.mubr.msk.f32.gmra.mrb[8].mxu1 %vm93_vm0, %v61_v34  ;;  %v2792_v34 = vpack.c.bf16 %v1391_v29, %v1390_v28 }
  0x1d   :  { %2471 = vmatprep.mubr.msk.f32.mxu0 %vm93_vm0, %v30_v30  ;;  %2519 = vmatprep.mubr.msk.f32.mxu1 %vm93_vm0, %v62_v36  ;;  %v1392_v30 = vld [vmem:[%s3829_s3 + $0x10] sm:$0xff] }
  0x1e   :  { %2793 = vmatprep.subr.bf16.mxu0 %v2792_v34 }
  0x1f   :  { %2795 = vmatpush3.bf16.msra.mxu0 %v2792_v34 }
  0x20   :  { %2472 = vmatmul.mubr.msk.f32.gmra.mrb[10].mxu0 %vm93_vm0, %v31_v35  ;;  %2520 = vmatmul.mubr.msk.f32.gmra.mrb[10].mxu1 %vm93_vm0, %v63_v41  ;;  %v1393_v35 = vld [vmem:[%s3829_s3 + $0x18] sm:$0xff] }
  0x21   :  { %2474 = vmatprep.mubr.msk.f32.mxu0 %vm93_vm0, %v32_v37  ;;  %2522 = vmatprep.mubr.msk.f32.mxu1 %vm93_vm0, %v64_v43  ;;  %v2796_v37 = vpack.c.bf16 %v1393_v35, %v1392_v30 }
  0x23   :  { %2797 = vmatprep.subr.bf16.mxu0 %v2796_v37 }
  0x24   :  { %2475 = vmatmul.mubr.msk.f32.gmra.mrb[12].mxu0 %vm93_vm0, %v33_v42  ;;  %2523 = vmatmul.mubr.msk.f32.gmra.mrb[12].mxu1 %vm93_vm0, %v65_v46 }
  0x25   :  { %2477 = vmatprep.mubr.msk.f32.mxu0 %vm93_vm0, %v34_v44  ;;  %2525 = vmatprep.mubr.msk.f32.mxu1 %vm93_vm0, %v66_v48 }
  0x26   :  { %2799 = vmatpush3.bf16.msra.mxu0 %v2796_v37 }
  0x28   :  { %2478 = vmatmul.mubr.msk.f32.gmra.mrb[14].mxu0 %vm93_vm0, %v35_v47  ;;  %2526 = vmatmul.mubr.msk.f32.gmra.mrb[14].mxu1 %vm93_vm0, %v67_v50 }
  0x29   :  { %2480 = vmatprep.mubr.msk.f32.mxu0 %vm93_vm0, %v36_v49  ;;  %2528 = vmatprep.mubr.msk.f32.mxu1 %vm93_vm0, %v68_v52 }
  0x2c   :  { %2481 = vmatmul.mubr.msk.f32.gmra.mrb[16].mxu0 %vm93_vm0, %v37_v51  ;;  %2529 = vmatmul.mubr.msk.f32.gmra.mrb[16].mxu1 %vm93_vm0, %v69_v54 }
  0x2d   :  { %2483 = vmatprep.mubr.msk.f32.mxu0 %vm93_vm0, %v38_v53  ;;  %2531 = vmatprep.mubr.msk.f32.mxu1 %vm93_vm0, %v70_v56 }
  0x30   :  { %2484 = vmatmul.mubr.msk.f32.gmra.mrb[18].mxu0 %vm93_vm0, %v39_v55  ;;  %2532 = vmatmul.mubr.msk.f32.gmra.mrb[18].mxu1 %vm93_vm0, %v71_v58 }
  0x31   :  { %2486 = vmatprep.mubr.msk.f32.mxu0 %vm93_vm0, %v40_v57  ;;  %2534 = vmatprep.mubr.msk.f32.mxu1 %vm93_vm0, %v72_v60 }
  0x34   :  { %2487 = vmatmul.mubr.msk.f32.gmra.mrb[20].mxu0 %vm93_vm0, %v41_v59  ;;  %2535 = vmatmul.mubr.msk.f32.gmra.mrb[20].mxu1 %vm93_vm0, %v73_v62 }
  0x35   :  { %2489 = vmatprep.mubr.msk.f32.mxu0 %vm93_vm0, %v42_v61  ;;  %2537 = vmatprep.mubr.msk.f32.mxu1 %vm93_vm0, %v74_v0 }
  0x38   :  { %2490 = vmatmul.mubr.msk.f32.gmra.mrb[22].mxu0 %vm93_vm0, %v43_v63  ;;  %2538 = vmatmul.mubr.msk.f32.gmra.mrb[22].mxu1 %vm93_vm0, %v75_v2 }
  0x39   :  { %2492 = vmatprep.mubr.msk.f32.mxu0 %vm93_vm0, %v44_v1  ;;  %2540 = vmatprep.mubr.msk.f32.mxu1 %vm93_vm0, %v76_v4 }
  0x3c   :  { %2493 = vmatmul.mubr.msk.f32.gmra.mrb[24].mxu0 %vm93_vm0, %v45_v3  ;;  %2541 = vmatmul.mubr.msk.f32.gmra.mrb[24].mxu1 %vm93_vm0, %v77_v6 }
  0x3d   :  { %2495 = vmatprep.mubr.msk.f32.mxu0 %vm93_vm0, %v46_v5  ;;  %2543 = vmatprep.mubr.msk.f32.mxu1 %vm93_vm0, %v78_v8 }
  0x40   :  { %2496 = vmatmul.mubr.msk.f32.gmra.mrb[26].mxu0 %vm93_vm0, %v47_v7  ;;  %2544 = vmatmul.mubr.msk.f32.gmra.mrb[26].mxu1 %vm93_vm0, %v79_v10 }
  0x41   :  { %2498 = vmatprep.mubr.msk.f32.mxu0 %vm93_vm0, %v48_v9  ;;  %2546 = vmatprep.mubr.msk.f32.mxu1 %vm93_vm0, %v80_v12 }
  0x44   :  { %2499 = vmatmul.mubr.msk.f32.gmra.mrb[28].mxu0 %vm93_vm0, %v49_v11  ;;  %2547 = vmatmul.mubr.msk.f32.gmra.mrb[28].mxu1 %vm93_vm0, %v81_v14 }
  0x45   :  { %2501 = vmatprep.mubr.msk.f32.mxu0 %vm93_vm0, %v50_v13  ;;  %2549 = vmatprep.mubr.msk.f32.mxu1 %vm93_vm0, %v82_v16 }
  0x48   :  { %2502 = vmatmul.mubr.msk.f32.gmra.mrb[30].mxu0 %vm93_vm0, %v51_v15  ;;  %2550 = vmatmul.mubr.msk.f32.gmra.mrb[30].mxu1 %vm93_vm0, %v83_v17 }
  0xdf   :  { %v2458_v19 = vpop.f32.mrb[0].mxu0  ;;  %v2506_v23 = vpop.f32.mrb[0].mxu1 }
  0xe0   :  { %v358_v20 = vadd.f32 %v2458_v19, %v3129_v18  ;;  %v352_v21 = vpop.f32.mrb[1].mxu0  ;;  %v3134_v26 = vadd.f32 %v2506_v23, %v3129_v18  ;;  %v3136_v27 = vpop.f32.mrb[1].mxu1 }
  0xe1   :  { %v353_v22 = vadd.f32 %v3129_v18, %v352_v21 }
  0xe2   :  { %v672_v31 = vmax.f32 %v358_v20, 0.0 }
  0xe3   :  { %v671_v24 = vmax.f32 %v353_v22, 0.0  ;;  %v2461_v25 = vpop.f32.mrb[2].mxu0  ;;  %v2509_v38 = vpop.f32.mrb[2].mxu1 }
  0xe4   :  { %v368_v32 = vadd.f32 %v2461_v25, %v3129_v18  ;;  %v362_v33 = vpop.f32.mrb[3].mxu0  ;;  %v3155_v41 = vadd.f32 %v2509_v38, %v3129_v18  ;;  %v522_v42 = vpop.f32.mrb[3].mxu1 }
  0xe5   :  { %v363_v36 = vadd.f32 %v3129_v18, %v362_v33  ;;  %2568 = vmatprep.mubr.msk.f32.mxu1 %vm748_vm1, %v671_v24  ;;  %v3159_v46 = vadd.f32 %v3129_v18, %v522_v42 }
  0xe6   :  { %2569 = vmatmul.mubr.msk.f32.vlgmr.msra.gmra.mrb[32].mxu1 %vm748_vm1, %v672_v31  ;;  %v674_v43 = vmax.f32 %v368_v32, 0.0 }
  0xe7   :  { %v673_v39 = vmax.f32 %v363_v36, 0.0  ;;  %v2464_v40 = vpop.f32.mrb[4].mxu0  ;;  %v2512_v48 = vpop.f32.mrb[4].mxu1 }
  0xe8   :  { %v378_v44 = vadd.f32 %v2464_v40, %v3129_v18  ;;  %v372_v45 = vpop.f32.mrb[5].mxu0  ;;  %v3165_v51 = vadd.f32 %v2512_v48, %v3129_v18  ;;  %v532_v52 = vpop.f32.mrb[5].mxu1 }
  0xe9   :  { %v373_v47 = vadd.f32 %v3129_v18, %v372_v45  ;;  %2571 = vmatprep.mubr.msk.f32.mxu1 %vm748_vm1, %v673_v39  ;;  %v3169_v56 = vadd.f32 %v3129_v18, %v532_v52 }
  0xea   :  { %2572 = vmatmul.mubr.msk.f32.gmra.mrb[34].mxu1 %vm748_vm1, %v674_v43  ;;  %v676_v53 = vmax.f32 %v378_v44, 0.0 }
  0xeb   :  { %v675_v49 = vmax.f32 %v373_v47, 0.0  ;;  %v2467_v50 = vpop.f32.mrb[6].mxu0  ;;  %v2515_v58 = vpop.f32.mrb[6].mxu1 }
  0xec   :  { %v388_v54 = vadd.f32 %v2467_v50, %v3129_v18  ;;  %v382_v55 = vpop.f32.mrb[7].mxu0  ;;  %v3175_v61 = vadd.f32 %v2515_v58, %v3129_v18  ;;  %v542_v62 = vpop.f32.mrb[7].mxu1 }
  0xed   :  { %v383_v57 = vadd.f32 %v3129_v18, %v382_v55  ;;  %2574 = vmatprep.mubr.msk.f32.mxu1 %vm748_vm1, %v675_v49  ;;  %v3179_v2 = vadd.f32 %v3129_v18, %v542_v62 }
  0xee   :  { %2575 = vmatmul.mubr.msk.f32.gmra.mrb[36].mxu1 %vm748_vm1, %v676_v53  ;;  %v678_v63 = vmax.f32 %v388_v54, 0.0 }
  0xef   :  { %v677_v59 = vmax.f32 %v383_v57, 0.0  ;;  %v2470_v60 = vpop.f32.mrb[8].mxu0  ;;  %v2518_v4 = vpop.f32.mrb[8].mxu1 }
  0xf0   :  { %v398_v0 = vadd.f32 %v2470_v60, %v3129_v18  ;;  %v392_v1 = vpop.f32.mrb[9].mxu0  ;;  %v3185_v7 = vadd.f32 %v2518_v4, %v3129_v18  ;;  %v552_v8 = vpop.f32.mrb[9].mxu1 }
  0xf1   :  { %v393_v3 = vadd.f32 %v3129_v18, %v392_v1  ;;  %2577 = vmatprep.mubr.msk.f32.mxu1 %vm748_vm1, %v677_v59  ;;  %v3189_v12 = vadd.f32 %v3129_v18, %v552_v8 }
  0xf2   :  { %2578 = vmatmul.mubr.msk.f32.gmra.mrb[38].mxu1 %vm748_vm1, %v678_v63  ;;  %v680_v9 = vmax.f32 %v398_v0, 0.0 }
  0xf3   :  { %v679_v5 = vmax.f32 %v393_v3, 0.0  ;;  %v2473_v6 = vpop.f32.mrb[10].mxu0  ;;  %v2521_v14 = vpop.f32.mrb[10].mxu1 }
  0xf4   :  { %v408_v10 = vadd.f32 %v2473_v6, %v3129_v18  ;;  %v402_v11 = vpop.f32.mrb[11].mxu0  ;;  %v3195_v17 = vadd.f32 %v2521_v14, %v3129_v18  ;;  %v562_v19 = vpop.f32.mrb[11].mxu1 }
  0xf5   :  { %v403_v13 = vadd.f32 %v3129_v18, %v402_v11  ;;  %2580 = vmatprep.mubr.msk.f32.mxu1 %vm748_vm1, %v679_v5  ;;  %v3199_v23 = vadd.f32 %v3129_v18, %v562_v19 }
  0xf6   :  { %2581 = vmatmul.mubr.msk.f32.gmra.mrb[40].mxu1 %vm748_vm1, %v680_v9  ;;  %v682_v20 = vmax.f32 %v408_v10, 0.0 }
  0xf7   :  { %v681_v15 = vmax.f32 %v403_v13, 0.0  ;;  %v2476_v16 = vpop.f32.mrb[12].mxu0  ;;  %v2524_v25 = vpop.f32.mrb[12].mxu1 }
  0xf8   :  { %v418_v21 = vadd.f32 %v2476_v16, %v3129_v18  ;;  %v412_v22 = vpop.f32.mrb[13].mxu0  ;;  %v3205_v30 = vadd.f32 %v2524_v25, %v3129_v18  ;;  %v572_v31 = vpop.f32.mrb[13].mxu1 }
  0xf9   :  { %v413_v24 = vadd.f32 %v3129_v18, %v412_v22  ;;  %2583 = vmatprep.mubr.msk.f32.mxu1 %vm748_vm1, %v681_v15  ;;  %v3209_v35 = vadd.f32 %v3129_v18, %v572_v31 }
  0xfa   :  { %2584 = vmatmul.mubr.msk.f32.gmra.mrb[42].mxu1 %vm748_vm1, %v682_v20  ;;  %v684_v32 = vmax.f32 %v418_v21, 0.0 }
  0xfb   :  { %v683_v28 = vmax.f32 %v413_v24, 0.0  ;;  %v2479_v29 = vpop.f32.mrb[14].mxu0  ;;  %v2527_v37 = vpop.f32.mrb[14].mxu1 }
  0xfc   :  { %v428_v33 = vadd.f32 %v2479_v29, %v3129_v18  ;;  %v422_v34 = vpop.f32.mrb[15].mxu0  ;;  %v3215_v40 = vadd.f32 %v2527_v37, %v3129_v18  ;;  %v582_v42 = vpop.f32.mrb[15].mxu1 }
  0xfd   :  { %v423_v36 = vadd.f32 %v3129_v18, %v422_v34  ;;  %2586 = vmatprep.mubr.msk.f32.mxu1 %vm748_vm1, %v683_v28  ;;  %v3219_v47 = vadd.f32 %v3129_v18, %v582_v42 }
  0xfe   :  { %2587 = vmatmul.mubr.msk.f32.gmra.mrb[44].mxu1 %vm748_vm1, %v684_v32  ;;  %v686_v43 = vmax.f32 %v428_v33, 0.0 }
  0xff   :  { %v685_v38 = vmax.f32 %v423_v36, 0.0  ;;  %v2482_v39 = vpop.f32.mrb[16].mxu0  ;;  %v2530_v49 = vpop.f32.mrb[16].mxu1 }
 0x100   :  { %v438_v44 = vadd.f32 %v2482_v39, %v3129_v18  ;;  %v432_v45 = vpop.f32.mrb[17].mxu0  ;;  %v3225_v53 = vadd.f32 %v2530_v49, %v3129_v18  ;;  %v592_v54 = vpop.f32.mrb[17].mxu1 }
 0x101   :  { %v433_v48 = vadd.f32 %v3129_v18, %v432_v45  ;;  %2589 = vmatprep.mubr.msk.f32.mxu1 %vm748_vm1, %v685_v38  ;;  %v3229_v59 = vadd.f32 %v3129_v18, %v592_v54 }
 0x102   :  { %2590 = vmatmul.mubr.msk.f32.gmra.mrb[46].mxu1 %vm748_vm1, %v686_v43  ;;  %v688_v55 = vmax.f32 %v438_v44, 0.0 }
 0x103   :  { %v687_v50 = vmax.f32 %v433_v48, 0.0  ;;  %v2485_v52 = vpop.f32.mrb[18].mxu0  ;;  %v2533_v62 = vpop.f32.mrb[18].mxu1 }
 0x104   :  { %v448_v57 = vadd.f32 %v2485_v52, %v3129_v18  ;;  %v442_v58 = vpop.f32.mrb[19].mxu0  ;;  %v3235_v1 = vadd.f32 %v2533_v62, %v3129_v18  ;;  %v602_v3 = vpop.f32.mrb[19].mxu1 }
 0x105   :  { %v443_v60 = vadd.f32 %v3129_v18, %v442_v58  ;;  %2592 = vmatprep.mubr.msk.f32.mxu1 %vm748_vm1, %v687_v50  ;;  %v3239_v8 = vadd.f32 %v3129_v18, %v602_v3 }
 0x106   :  { %2593 = vmatmul.mubr.msk.f32.gmra.mrb[48].mxu1 %vm748_vm1, %v688_v55  ;;  %v690_v4 = vmax.f32 %v448_v57, 0.0 }
 0x107   :  { %v689_v63 = vmax.f32 %v443_v60, 0.0  ;;  %v2488_v0 = vpop.f32.mrb[20].mxu0  ;;  %v2536_v10 = vpop.f32.mrb[20].mxu1 }
 0x108   :  { %v458_v5 = vadd.f32 %v2488_v0, %v3129_v18  ;;  %v452_v6 = vpop.f32.mrb[21].mxu0  ;;  %v3245_v14 = vadd.f32 %v2536_v10, %v3129_v18  ;;  %v612_v15 = vpop.f32.mrb[21].mxu1  ;;  %v513_v10 = vadd.f32 %v3129_v18, %v3136_v27 }
 0x109   :  { %v453_v9 = vadd.f32 %v3129_v18, %v452_v6  ;;  %2595 = vmatprep.mubr.msk.f32.mxu1 %vm748_vm1, %v689_v63  ;;  %v3249_v21 = vadd.f32 %v3129_v18, %v612_v15 }
 0x10a   :  { %2596 = vmatmul.mubr.msk.f32.gmra.mrb[50].mxu1 %vm748_vm1, %v690_v4  ;;  %v692_v16 = vmax.f32 %v458_v5, 0.0  ;;  %v703_v27 = vmax.f32 %v513_v10, 0.0 }
 0x10b   :  { %v691_v11 = vmax.f32 %v453_v9, 0.0  ;;  %v2491_v13 = vpop.f32.mrb[22].mxu0  ;;  %v2539_v24 = vpop.f32.mrb[22].mxu1 }
 0x10c   :  { %v468_v19 = vadd.f32 %v2491_v13, %v3129_v18  ;;  %v462_v20 = vpop.f32.mrb[23].mxu0  ;;  %v3255_v29 = vadd.f32 %v2539_v24, %v3129_v18  ;;  %v622_v31 = vpop.f32.mrb[23].mxu1 }
 0x10d   :  { %v463_v22 = vadd.f32 %v3129_v18, %v462_v20  ;;  %2598 = vmatprep.mubr.msk.f32.mxu1 %vm748_vm1, %v691_v11  ;;  %v3259_v36 = vadd.f32 %v3129_v18, %v622_v31 }
 0x10e   :  { %2599 = vmatmul.mubr.msk.f32.gmra.mrb[52].mxu1 %vm748_vm1, %v692_v16  ;;  %v694_v32 = vmax.f32 %v468_v19, 0.0 }
 0x10f   :  { %v693_v25 = vmax.f32 %v463_v22, 0.0  ;;  %v2494_v28 = vpop.f32.mrb[24].mxu0  ;;  %v2542_v38 = vpop.f32.mrb[24].mxu1 }
 0x110   :  { %v478_v33 = vadd.f32 %v2494_v28, %v3129_v18  ;;  %v472_v34 = vpop.f32.mrb[25].mxu0  ;;  %v3265_v43 = vadd.f32 %v2542_v38, %v3129_v18  ;;  %v632_v44 = vpop.f32.mrb[25].mxu1  ;;  %v707_v38 = vmax.f32 %v3169_v56, 0.0  ;;  %v710_v56 = vmax.f32 %v3175_v61, 0.0 }
 0x111   :  { %v473_v37 = vadd.f32 %v3129_v18, %v472_v34  ;;  %2601 = vmatprep.mubr.msk.f32.mxu1 %vm748_vm1, %v693_v25  ;;  %v3269_v50 = vadd.f32 %v3129_v18, %v632_v44  ;;  %v705_v34 = vmax.f32 %v3159_v46, 0.0  ;;  %v708_v46 = vmax.f32 %v3165_v51, 0.0 }
 0x112   :  { %2602 = vmatmul.mubr.msk.f32.gmra.mrb[54].mxu1 %vm748_vm1, %v694_v32  ;;  %v696_v45 = vmax.f32 %v478_v33, 0.0  ;;  %v715_v51 = vmax.f32 %v3209_v35, 0.0  ;;  %v717_v61 = vmax.f32 %v3219_v47, 0.0  ;;  %v718_v35 = vmax.f32 %v3215_v40, 0.0 }
 0x113   :  { %v695_v39 = vmax.f32 %v473_v37, 0.0  ;;  %v2497_v42 = vpop.f32.mrb[26].mxu0  ;;  %v2545_v54 = vpop.f32.mrb[26].mxu1  ;;  %v704_v37 = vmax.f32 %v3134_v26, 0.0  ;;  %v711_v26 = vmax.f32 %v3189_v12, 0.0  ;;  %v714_v12 = vmax.f32 %v3195_v17, 0.0 }
 0x114   :  { %v488_v48 = vadd.f32 %v2497_v42, %v3129_v18  ;;  %v482_v49 = vpop.f32.mrb[27].mxu0  ;;  %v3275_v58 = vadd.f32 %v2545_v54, %v3129_v18  ;;  %v642_v60 = vpop.f32.mrb[27].mxu1  ;;  %v721_v17 = vmax.f32 %v3239_v8, 0.0  ;;  %v720_v47 = vmax.f32 %v3225_v53, 0.0 }
 0x115   :  { %v483_v52 = vadd.f32 %v3129_v18, %v482_v49  ;;  %2604 = vmatprep.mubr.msk.f32.mxu1 %vm748_vm1, %v695_v39  ;;  %v3279_v3 = vadd.f32 %v3129_v18, %v642_v60  ;;  %v706_v39 = vmax.f32 %v3155_v41, 0.0  ;;  %v713_v41 = vmax.f32 %v3199_v23, 0.0 }
 0x116   :  { %2605 = vmatmul.mubr.msk.f32.gmra.mrb[56].mxu1 %vm748_vm1, %v696_v45  ;;  %v698_v62 = vmax.f32 %v488_v48, 0.0  ;;  %v716_v23 = vmax.f32 %v3205_v30, 0.0  ;;  %v723_v30 = vmax.f32 %v3249_v21, 0.0  ;;  %v725_v40 = vmax.f32 %v3259_v36, 0.0  ;;  %v3370_v45 = vld [vmem:[%s3828_s4 + $0x1] ss:$0 sm:$0xff] }
 0x117   :  { %v697_v55 = vmax.f32 %v483_v52, 0.0  ;;  %v2500_v57 = vpop.f32.mrb[28].mxu0  ;;  %v2548_v5 = vpop.f32.mrb[28].mxu1  ;;  %v724_v8 = vmax.f32 %v3245_v14, 0.0  ;;  %v727_v53 = vmax.f32 %v3269_v50, 0.0  ;;  %v726_v21 = vmax.f32 %v3255_v29, 0.0 }
 0x118   :  { %v498_v63 = vadd.f32 %v2500_v57, %v3129_v18  ;;  %v492_v0 = vpop.f32.mrb[29].mxu0  ;;  %v3287_v11 = vadd.f32 %v2548_v5, %v3129_v18  ;;  %v652_v13 = vpop.f32.mrb[29].mxu1  ;;  %v728_v36 = vmax.f32 %v3265_v43, 0.0  ;;  %v730_v42 = vmax.f32 %v3275_v58, 0.0 }
 0x119   :  { %v493_v4 = vadd.f32 %v3129_v18, %v492_v0  ;;  %2607 = vmatprep.mubr.msk.f32.mxu1 %vm748_vm1, %v697_v55  ;;  %v3291_v20 = vadd.f32 %v3129_v18, %v652_v13 }
 0x11a   :  { %2608 = vmatmul.mubr.msk.f32.gmra.mrb[58].mxu1 %vm748_vm1, %v698_v62  ;;  %v700_v15 = vmax.f32 %v498_v63, 0.0  ;;  %v732_v44 = vmax.f32 %v3287_v11, 0.0 }
 0x11b   :  { %v699_v6 = vmax.f32 %v493_v4, 0.0  ;;  %v2503_v9 = vpop.f32.mrb[30].mxu0  ;;  %v2551_v24 = vpop.f32.mrb[30].mxu1  ;;  %v731_v14 = vmax.f32 %v3291_v20, 0.0 }
 0x11c   :  { %v508_v16 = vadd.f32 %v2503_v9, %v3129_v18  ;;  %v502_v19 = vpop.f32.mrb[31].mxu0  ;;  %v3297_v28 = vadd.f32 %v2551_v24, %v3129_v18  ;;  %v662_v31 = vpop.f32.mrb[31].mxu1 }
 0x11d   :  { %v503_v22 = vadd.f32 %v3129_v18, %v502_v19  ;;  %2610 = vmatprep.mubr.msk.f32.mxu1 %vm748_vm1, %v699_v6  ;;  %v3300_v33 = vadd.f32 %v3129_v18, %v662_v31  ;;  %v709_v18 = vmax.f32 %v3179_v2, 0.0  ;;  %v712_v2 = vmax.f32 %v3185_v7, 0.0 }
 0x11e   :  { %2611 = vmatmul.mubr.msk.f32.gmra.mrb[60].mxu1 %vm748_vm1, %v700_v15  ;;  %v702_v32 = vmax.f32 %v508_v16, 0.0  ;;  %v719_v7 = vmax.f32 %v3229_v59, 0.0  ;;  %v722_v59 = vmax.f32 %v3235_v1, 0.0  ;;  %v729_v1 = vmax.f32 %v3279_v3, 0.0 }
 0x11f   :  { %v701_v25 = vmax.f32 %v503_v22, 0.0  ;;  %v733_v29 = vmax.f32 %v3300_v33, 0.0  ;;  %v734_v43 = vmax.f32 %v3297_v28, 0.0 }
 0x121   :  { %2613 = vmatprep.mubr.msk.f32.mxu1 %vm748_vm1, %v701_v25 }
 0x122   :  { %2614 = vmatmul.mubr.msk.f32.gmra.mrb[62].mxu1 %vm748_vm1, %v702_v32 }
 0x123   :  { %2616 = vmatprep.mubr.msk.f32.mxu1 %vm748_vm1, %v703_v27 }
 0x126   :  { %2617 = vmatmul.mubr.msk.f32.gmra.mrb[64].mxu1 %vm748_vm1, %v704_v37 }
 0x127   :  { %2619 = vmatprep.mubr.msk.f32.mxu1 %vm748_vm1, %v705_v34 }
 0x12a   :  { %2620 = vmatmul.mubr.msk.f32.gmra.mrb[66].mxu1 %vm748_vm1, %v706_v39 }
 0x12b   :  { %2622 = vmatprep.mubr.msk.f32.mxu1 %vm748_vm1, %v707_v38 }
 0x12e   :  { %2623 = vmatmul.mubr.msk.f32.gmra.mrb[68].mxu1 %vm748_vm1, %v708_v46 }
 0x12f   :  { %2625 = vmatprep.mubr.msk.f32.mxu1 %vm748_vm1, %v709_v18 }
 0x132   :  { %2626 = vmatmul.mubr.msk.f32.gmra.mrb[70].mxu1 %vm748_vm1, %v710_v56 }
 0x133   :  { %2628 = vmatprep.mubr.msk.f32.mxu1 %vm748_vm1, %v711_v26 }
 0x136   :  { %2629 = vmatmul.mubr.msk.f32.gmra.mrb[72].mxu1 %vm748_vm1, %v712_v2 }
 0x137   :  { %2631 = vmatprep.mubr.msk.f32.mxu1 %vm748_vm1, %v713_v41 }
 0x13a   :  { %2632 = vmatmul.mubr.msk.f32.gmra.mrb[74].mxu1 %vm748_vm1, %v714_v12 }
 0x13b   :  { %2634 = vmatprep.mubr.msk.f32.mxu1 %vm748_vm1, %v715_v51 }
 0x13e   :  { %2635 = vmatmul.mubr.msk.f32.gmra.mrb[76].mxu1 %vm748_vm1, %v716_v23 }
 0x13f   :  { %2637 = vmatprep.mubr.msk.f32.mxu1 %vm748_vm1, %v717_v61 }
 0x142   :  { %2638 = vmatmul.mubr.msk.f32.gmra.mrb[78].mxu1 %vm748_vm1, %v718_v35 }
 0x143   :  { %2640 = vmatprep.mubr.msk.f32.mxu1 %vm748_vm1, %v719_v7 }
 0x146   :  { %2641 = vmatmul.mubr.msk.f32.gmra.mrb[80].mxu1 %vm748_vm1, %v720_v47 }
 0x147   :  { %2643 = vmatprep.mubr.msk.f32.mxu1 %vm748_vm1, %v721_v17 }
 0x14a   :  { %2644 = vmatmul.mubr.msk.f32.gmra.mrb[82].mxu1 %vm748_vm1, %v722_v59 }
 0x14b   :  { %2646 = vmatprep.mubr.msk.f32.mxu1 %vm748_vm1, %v723_v30 }
 0x14e   :  { %2647 = vmatmul.mubr.msk.f32.gmra.mrb[84].mxu1 %vm748_vm1, %v724_v8 }
 0x14f   :  { %2649 = vmatprep.mubr.msk.f32.mxu1 %vm748_vm1, %v725_v40 }
 0x152   :  { %2650 = vmatmul.mubr.msk.f32.gmra.mrb[86].mxu1 %vm748_vm1, %v726_v21 }
 0x153   :  { %2652 = vmatprep.mubr.msk.f32.mxu1 %vm748_vm1, %v727_v53 }
 0x156   :  { %2653 = vmatmul.mubr.msk.f32.gmra.mrb[88].mxu1 %vm748_vm1, %v728_v36 }
 0x157   :  { %2655 = vmatprep.mubr.msk.f32.mxu1 %vm748_vm1, %v729_v1 }
 0x15a   :  { %2656 = vmatmul.mubr.msk.f32.gmra.mrb[90].mxu1 %vm748_vm1, %v730_v42 }
 0x15b   :  { %2658 = vmatprep.mubr.msk.f32.mxu1 %vm748_vm1, %v731_v14 }
 0x15e   :  { %2659 = vmatmul.mubr.msk.f32.gmra.mrb[92].mxu1 %vm748_vm1, %v732_v44 }
 0x15f   :  { %2661 = vmatprep.mubr.msk.f32.mxu1 %vm748_vm1, %v733_v29 }
 0x162   :  { %2662 = vmatmul.mubr.msk.f32.gmra.mrb[94].mxu1 %vm748_vm1, %v734_v43 }
 0x1b9   :  { %v2570_v48 = vpop.f32.mrb[32].mxu1 }
 0x1ba   :  { %v1013_v49 = vadd.f32 %v2570_v48, %v3370_v45  ;;  %v1007_v50 = vpop.f32.mrb[33].mxu1 }
 0x1bb   :  { %v1008_v52 = vadd.f32 %v3370_v45, %v1007_v50 }
 0x1bc   :  { %v1327_v57 = vmax.f32 %v1013_v49, 0.0 }
 0x1bd   :  { %v1326_v54 = vmax.f32 %v1008_v52, 0.0  ;;  %v2573_v55 = vpop.f32.mrb[34].mxu1 }
 0x1be   :  { %v1023_v58 = vadd.f32 %v2573_v55, %v3370_v45  ;;  %v1017_v60 = vpop.f32.mrb[35].mxu1 }
 0x1bf   :  { %v1018_v62 = vadd.f32 %v3370_v45, %v1017_v60  ;;  %2672 = vmatprep.mubr.msk.f32.mxu0 %vm93_vm0, %v1326_v54 }
 0x1c0   :  { %2673 = vmatmul.mubr.msk.f32.vlgmr.msra.gmra.mrb[32].mxu0 %vm93_vm0, %v1327_v57  ;;  %v1329_v3 = vmax.f32 %v1023_v58, 0.0 }
 0x1c1   :  { %v1328_v63 = vmax.f32 %v1018_v62, 0.0  ;;  %v2576_v0 = vpop.f32.mrb[36].mxu1 }
 0x1c2   :  { %v1033_v4 = vadd.f32 %v2576_v0, %v3370_v45  ;;  %v1027_v5 = vpop.f32.mrb[37].mxu1 }
 0x1c3   :  { %v1028_v6 = vadd.f32 %v3370_v45, %v1027_v5  ;;  %2675 = vmatprep.mubr.msk.f32.mxu0 %vm93_vm0, %v1328_v63 }
 0x1c4   :  { %2676 = vmatmul.mubr.msk.f32.gmra.mrb[34].mxu0 %vm93_vm0, %v1329_v3  ;;  %v1331_v11 = vmax.f32 %v1033_v4, 0.0 }
 0x1c5   :  { %v1330_v9 = vmax.f32 %v1028_v6, 0.0  ;;  %v2579_v10 = vpop.f32.mrb[38].mxu1 }
 0x1c6   :  { %v1043_v13 = vadd.f32 %v2579_v10, %v3370_v45  ;;  %v1037_v15 = vpop.f32.mrb[39].mxu1 }
 0x1c7   :  { %v1038_v16 = vadd.f32 %v3370_v45, %v1037_v15  ;;  %2678 = vmatprep.mubr.msk.f32.mxu0 %vm93_vm0, %v1330_v9 }
 0x1c8   :  { %2679 = vmatmul.mubr.msk.f32.gmra.mrb[36].mxu0 %vm93_vm0, %v1331_v11  ;;  %v1333_v22 = vmax.f32 %v1043_v13, 0.0 }
 0x1c9   :  { %v1332_v19 = vmax.f32 %v1038_v16, 0.0  ;;  %v2582_v20 = vpop.f32.mrb[40].mxu1 }
 0x1ca   :  { %v1053_v24 = vadd.f32 %v2582_v20, %v3370_v45  ;;  %v1047_v25 = vpop.f32.mrb[41].mxu1 }
 0x1cb   :  { %v1048_v27 = vadd.f32 %v3370_v45, %v1047_v25  ;;  %2681 = vmatprep.mubr.msk.f32.mxu0 %vm93_vm0, %v1332_v19 }
 0x1cc   :  { %2682 = vmatmul.mubr.msk.f32.gmra.mrb[38].mxu0 %vm93_vm0, %v1333_v22  ;;  %v1335_v32 = vmax.f32 %v1053_v24, 0.0 }
 0x1cd   :  { %v1334_v28 = vmax.f32 %v1048_v27, 0.0  ;;  %v2585_v31 = vpop.f32.mrb[42].mxu1 }
 0x1ce   :  { %v1063_v33 = vadd.f32 %v2585_v31, %v3370_v45  ;;  %v1057_v34 = vpop.f32.mrb[43].mxu1 }
 0x1cf   :  { %v1058_v37 = vadd.f32 %v3370_v45, %v1057_v34  ;;  %2684 = vmatprep.mubr.msk.f32.mxu0 %vm93_vm0, %v1334_v28 }
 0x1d0   :  { %2685 = vmatmul.mubr.msk.f32.gmra.mrb[40].mxu0 %vm93_vm0, %v1335_v32  ;;  %v1337_v18 = vmax.f32 %v1063_v33, 0.0 }
 0x1d1   :  { %v1336_v38 = vmax.f32 %v1058_v37, 0.0  ;;  %v2588_v39 = vpop.f32.mrb[44].mxu1 }
 0x1d2   :  { %v1073_v46 = vadd.f32 %v2588_v39, %v3370_v45  ;;  %v1067_v26 = vpop.f32.mrb[45].mxu1 }
 0x1d3   :  { %v1068_v56 = vadd.f32 %v3370_v45, %v1067_v26  ;;  %2687 = vmatprep.mubr.msk.f32.mxu0 %vm93_vm0, %v1336_v38 }
 0x1d4   :  { %2688 = vmatmul.mubr.msk.f32.gmra.mrb[42].mxu0 %vm93_vm0, %v1337_v18  ;;  %v1339_v51 = vmax.f32 %v1073_v46, 0.0 }
 0x1d5   :  { %v1338_v41 = vmax.f32 %v1068_v56, 0.0  ;;  %v2591_v2 = vpop.f32.mrb[46].mxu1 }
 0x1d6   :  { %v1083_v12 = vadd.f32 %v2591_v2, %v3370_v45  ;;  %v1077_v61 = vpop.f32.mrb[47].mxu1 }
 0x1d7   :  { %v1078_v23 = vadd.f32 %v3370_v45, %v1077_v61  ;;  %2690 = vmatprep.mubr.msk.f32.mxu0 %vm93_vm0, %v1338_v41 }
 0x1d8   :  { %2691 = vmatmul.mubr.msk.f32.gmra.mrb[44].mxu0 %vm93_vm0, %v1339_v51  ;;  %v1341_v17 = vmax.f32 %v1083_v12, 0.0 }
 0x1d9   :  { %v1340_v7 = vmax.f32 %v1078_v23, 0.0  ;;  %v2594_v35 = vpop.f32.mrb[48].mxu1 }
 0x1da   :  { %v1093_v47 = vadd.f32 %v2594_v35, %v3370_v45  ;;  %v1087_v30 = vpop.f32.mrb[49].mxu1 }
 0x1db   :  { %v1088_v59 = vadd.f32 %v3370_v45, %v1087_v30  ;;  %2693 = vmatprep.mubr.msk.f32.mxu0 %vm93_vm0, %v1340_v7 }
 0x1dc   :  { %2694 = vmatmul.mubr.msk.f32.gmra.mrb[46].mxu0 %vm93_vm0, %v1341_v17  ;;  %v1343_v53 = vmax.f32 %v1093_v47, 0.0 }
 0x1dd   :  { %v1342_v40 = vmax.f32 %v1088_v59, 0.0  ;;  %v2597_v8 = vpop.f32.mrb[50].mxu1 }
 0x1de   :  { %v1103_v21 = vadd.f32 %v2597_v8, %v3370_v45  ;;  %v1097_v1 = vpop.f32.mrb[51].mxu1 }
 0x1df   :  { %v1098_v36 = vadd.f32 %v3370_v45, %v1097_v1  ;;  %2696 = vmatprep.mubr.msk.f32.mxu0 %vm93_vm0, %v1342_v40 }
 0x1e0   :  { %2697 = vmatmul.mubr.msk.f32.gmra.mrb[48].mxu0 %vm93_vm0, %v1343_v53  ;;  %v1345_v29 = vmax.f32 %v1103_v21, 0.0 }
 0x1e1   :  { %v1344_v14 = vmax.f32 %v1098_v36, 0.0  ;;  %v2600_v42 = vpop.f32.mrb[52].mxu1 }
 0x1e2   :  { %v1113_v44 = vadd.f32 %v2600_v42, %v3370_v45  ;;  %v1107_v43 = vpop.f32.mrb[53].mxu1 }
 0x1e3   :  { %v1108_v48 = vadd.f32 %v3370_v45, %v1107_v43  ;;  %2699 = vmatprep.mubr.msk.f32.mxu0 %vm93_vm0, %v1344_v14 }
 0x1e4   :  { %2700 = vmatmul.mubr.msk.f32.gmra.mrb[50].mxu0 %vm93_vm0, %v1345_v29  ;;  %v1347_v52 = vmax.f32 %v1113_v44, 0.0 }
 0x1e5   :  { %v1346_v49 = vmax.f32 %v1108_v48, 0.0  ;;  %v2603_v50 = vpop.f32.mrb[54].mxu1 }
 0x1e6   :  { %v1123_v54 = vadd.f32 %v2603_v50, %v3370_v45  ;;  %v1117_v55 = vpop.f32.mrb[55].mxu1 }
 0x1e7   :  { %v1118_v57 = vadd.f32 %v3370_v45, %v1117_v55  ;;  %2702 = vmatprep.mubr.msk.f32.mxu0 %vm93_vm0, %v1346_v49 }
 0x1e8   :  { %2703 = vmatmul.mubr.msk.f32.gmra.mrb[52].mxu0 %vm93_vm0, %v1347_v52  ;;  %v1349_v62 = vmax.f32 %v1123_v54, 0.0 }
 0x1e9   :  { %v1348_v58 = vmax.f32 %v1118_v57, 0.0  ;;  %v2606_v60 = vpop.f32.mrb[56].mxu1 }
 0x1ea   :  { %v1133_v63 = vadd.f32 %v2606_v60, %v3370_v45  ;;  %v1127_v0 = vpop.f32.mrb[57].mxu1 }
 0x1eb   :  { %v1128_v3 = vadd.f32 %v3370_v45, %v1127_v0  ;;  %2705 = vmatprep.mubr.msk.f32.mxu0 %vm93_vm0, %v1348_v58 }
 0x1ec   :  { %2706 = vmatmul.mubr.msk.f32.gmra.mrb[54].mxu0 %vm93_vm0, %v1349_v62  ;;  %v1351_v6 = vmax.f32 %v1133_v63, 0.0 }
 0x1ed   :  { %v1350_v4 = vmax.f32 %v1128_v3, 0.0  ;;  %v2609_v5 = vpop.f32.mrb[58].mxu1 }
 0x1ee   :  { %v1143_v9 = vadd.f32 %v2609_v5, %v3370_v45  ;;  %v1137_v10 = vpop.f32.mrb[59].mxu1 }
 0x1ef   :  { %v1138_v11 = vadd.f32 %v3370_v45, %v1137_v10  ;;  %2708 = vmatprep.mubr.msk.f32.mxu0 %vm93_vm0, %v1350_v4 }
 0x1f0   :  { %2709 = vmatmul.mubr.msk.f32.gmra.mrb[56].mxu0 %vm93_vm0, %v1351_v6  ;;  %v1353_v16 = vmax.f32 %v1143_v9, 0.0 }
 0x1f1   :  { %v1352_v13 = vmax.f32 %v1138_v11, 0.0  ;;  %v2612_v15 = vpop.f32.mrb[60].mxu1 }
 0x1f2   :  { %v1153_v19 = vadd.f32 %v2612_v15, %v3370_v45  ;;  %v1147_v20 = vpop.f32.mrb[61].mxu1 }
 0x1f3   :  { %v1148_v22 = vadd.f32 %v3370_v45, %v1147_v20  ;;  %2711 = vmatprep.mubr.msk.f32.mxu0 %vm93_vm0, %v1352_v13 }
 0x1f4   :  { %2712 = vmatmul.mubr.msk.f32.gmra.mrb[58].mxu0 %vm93_vm0, %v1353_v16  ;;  %v1355_v27 = vmax.f32 %v1153_v19, 0.0 }
 0x1f5   :  { %v1354_v24 = vmax.f32 %v1148_v22, 0.0  ;;  %v2615_v25 = vpop.f32.mrb[62].mxu1 }
 0x1f6   :  { %v1163_v28 = vadd.f32 %v2615_v25, %v3370_v45  ;;  %v1157_v31 = vpop.f32.mrb[63].mxu1 }
 0x1f7   :  { %v1158_v32 = vadd.f32 %v3370_v45, %v1157_v31  ;;  %2714 = vmatprep.mubr.msk.f32.mxu0 %vm93_vm0, %v1354_v24 }
 0x1f8   :  { %2715 = vmatmul.mubr.msk.f32.gmra.mrb[60].mxu0 %vm93_vm0, %v1355_v27  ;;  %v1357_v37 = vmax.f32 %v1163_v28, 0.0 }
 0x1f9   :  { %v1356_v33 = vmax.f32 %v1158_v32, 0.0  ;;  %v2618_v34 = vpop.f32.mrb[64].mxu1 }
 0x1fa   :  { %v1173_v38 = vadd.f32 %v2618_v34, %v3370_v45  ;;  %v1167_v39 = vpop.f32.mrb[65].mxu1 }
 0x1fb   :  { %v1168_v18 = vadd.f32 %v3370_v45, %v1167_v39  ;;  %2717 = vmatprep.mubr.msk.f32.mxu0 %vm93_vm0, %v1356_v33 }
 0x1fc   :  { %2718 = vmatmul.mubr.msk.f32.gmra.mrb[62].mxu0 %vm93_vm0, %v1357_v37  ;;  %v1359_v56 = vmax.f32 %v1173_v38, 0.0 }
 0x1fd   :  { %v1358_v46 = vmax.f32 %v1168_v18, 0.0  ;;  %v2621_v26 = vpop.f32.mrb[66].mxu1 }
 0x1fe   :  { %v1183_v41 = vadd.f32 %v2621_v26, %v3370_v45  ;;  %v1177_v2 = vpop.f32.mrb[67].mxu1 }
 0x1ff   :  { %v1178_v51 = vadd.f32 %v3370_v45, %v1177_v2  ;;  %2720 = vmatprep.mubr.msk.f32.mxu0 %vm93_vm0, %v1358_v46 }
 0x200   :  { %2721 = vmatmul.mubr.msk.f32.gmra.mrb[64].mxu0 %vm93_vm0, %v1359_v56  ;;  %v1361_v23 = vmax.f32 %v1183_v41, 0.0 }
 0x201   :  { %v1360_v12 = vmax.f32 %v1178_v51, 0.0  ;;  %v2624_v61 = vpop.f32.mrb[68].mxu1 }
 0x202   :  { %v1193_v7 = vadd.f32 %v2624_v61, %v3370_v45  ;;  %v1187_v35 = vpop.f32.mrb[69].mxu1 }
 0x203   :  { %v1188_v17 = vadd.f32 %v3370_v45, %v1187_v35  ;;  %2723 = vmatprep.mubr.msk.f32.mxu0 %vm93_vm0, %v1360_v12 }
 0x204   :  { %2724 = vmatmul.mubr.msk.f32.gmra.mrb[66].mxu0 %vm93_vm0, %v1361_v23  ;;  %v1363_v59 = vmax.f32 %v1193_v7, 0.0 }
 0x205   :  { %v1362_v47 = vmax.f32 %v1188_v17, 0.0  ;;  %v2627_v30 = vpop.f32.mrb[70].mxu1 }
 0x206   :  { %v1203_v40 = vadd.f32 %v2627_v30, %v3370_v45  ;;  %v1197_v8 = vpop.f32.mrb[71].mxu1 }
 0x207   :  { %v1198_v53 = vadd.f32 %v3370_v45, %v1197_v8  ;;  %2726 = vmatprep.mubr.msk.f32.mxu0 %vm93_vm0, %v1362_v47 }
 0x208   :  { %2727 = vmatmul.mubr.msk.f32.gmra.mrb[68].mxu0 %vm93_vm0, %v1363_v59  ;;  %v1365_v36 = vmax.f32 %v1203_v40, 0.0 }
 0x209   :  { %v1364_v21 = vmax.f32 %v1198_v53, 0.0  ;;  %v2630_v1 = vpop.f32.mrb[72].mxu1 }
 0x20a   :  { %v1213_v14 = vadd.f32 %v2630_v1, %v3370_v45  ;;  %v1207_v42 = vpop.f32.mrb[73].mxu1 }
 0x20b   :  { %v1208_v29 = vadd.f32 %v3370_v45, %v1207_v42  ;;  %2729 = vmatprep.mubr.msk.f32.mxu0 %vm93_vm0, %v1364_v21 }
 0x20c   :  { %2730 = vmatmul.mubr.msk.f32.gmra.mrb[70].mxu0 %vm93_vm0, %v1365_v36  ;;  %v1367_v48 = vmax.f32 %v1213_v14, 0.0 }
 0x20d   :  { %v1366_v44 = vmax.f32 %v1208_v29, 0.0  ;;  %v2633_v43 = vpop.f32.mrb[74].mxu1 }
 0x20e   :  { %v1223_v49 = vadd.f32 %v2633_v43, %v3370_v45  ;;  %v1217_v50 = vpop.f32.mrb[75].mxu1 }
 0x20f   :  { %v1218_v52 = vadd.f32 %v3370_v45, %v1217_v50  ;;  %2732 = vmatprep.mubr.msk.f32.mxu0 %vm93_vm0, %v1366_v44 }
 0x210   :  { %2733 = vmatmul.mubr.msk.f32.gmra.mrb[72].mxu0 %vm93_vm0, %v1367_v48  ;;  %v1369_v57 = vmax.f32 %v1223_v49, 0.0 }
 0x211   :  { %v1368_v54 = vmax.f32 %v1218_v52, 0.0  ;;  %v2636_v55 = vpop.f32.mrb[76].mxu1  ;;  %v3503_v52 = vld [vmem:[%s3828_s4 + $0x2] ss:$0 sm:$0xff] }
 0x212   :  { %v1233_v58 = vadd.f32 %v2636_v55, %v3370_v45  ;;  %v1227_v60 = vpop.f32.mrb[77].mxu1 }
 0x213   :  { %v1228_v62 = vadd.f32 %v3370_v45, %v1227_v60  ;;  %2735 = vmatprep.mubr.msk.f32.mxu0 %vm93_vm0, %v1368_v54 }
 0x214   :  { %2736 = vmatmul.mubr.msk.f32.gmra.mrb[74].mxu0 %vm93_vm0, %v1369_v57  ;;  %v1371_v3 = vmax.f32 %v1233_v58, 0.0 }
 0x215   :  { %v1370_v63 = vmax.f32 %v1228_v62, 0.0  ;;  %v2639_v0 = vpop.f32.mrb[78].mxu1 }
 0x216   :  { %v1243_v4 = vadd.f32 %v2639_v0, %v3370_v45  ;;  %v1237_v5 = vpop.f32.mrb[79].mxu1 }
 0x217   :  { %v1238_v6 = vadd.f32 %v3370_v45, %v1237_v5  ;;  %2738 = vmatprep.mubr.msk.f32.mxu0 %vm93_vm0, %v1370_v63 }
 0x218   :  { %2739 = vmatmul.mubr.msk.f32.gmra.mrb[76].mxu0 %vm93_vm0, %v1371_v3  ;;  %v1373_v11 = vmax.f32 %v1243_v4, 0.0 }
 0x219   :  { %v1372_v9 = vmax.f32 %v1238_v6, 0.0  ;;  %v2642_v10 = vpop.f32.mrb[80].mxu1 }
 0x21a   :  { %v1253_v13 = vadd.f32 %v2642_v10, %v3370_v45  ;;  %v1247_v15 = vpop.f32.mrb[81].mxu1 }
 0x21b   :  { %v1248_v16 = vadd.f32 %v3370_v45, %v1247_v15  ;;  %2741 = vmatprep.mubr.msk.f32.mxu0 %vm93_vm0, %v1372_v9 }
 0x21c   :  { %2742 = vmatmul.mubr.msk.f32.gmra.mrb[78].mxu0 %vm93_vm0, %v1373_v11  ;;  %v1375_v22 = vmax.f32 %v1253_v13, 0.0 }
 0x21d   :  { %v1374_v19 = vmax.f32 %v1248_v16, 0.0  ;;  %v2645_v20 = vpop.f32.mrb[82].mxu1 }
 0x21e   :  { %v1263_v24 = vadd.f32 %v2645_v20, %v3370_v45  ;;  %v1257_v25 = vpop.f32.mrb[83].mxu1 }
 0x21f   :  { %v1258_v27 = vadd.f32 %v3370_v45, %v1257_v25  ;;  %2744 = vmatprep.mubr.msk.f32.mxu0 %vm93_vm0, %v1374_v19 }
 0x220   :  { %2745 = vmatmul.mubr.msk.f32.gmra.mrb[80].mxu0 %vm93_vm0, %v1375_v22  ;;  %v1377_v32 = vmax.f32 %v1263_v24, 0.0 }
 0x221   :  { %v1376_v28 = vmax.f32 %v1258_v27, 0.0  ;;  %v2648_v31 = vpop.f32.mrb[84].mxu1 }
 0x222   :  { %v1273_v33 = vadd.f32 %v2648_v31, %v3370_v45  ;;  %v1267_v34 = vpop.f32.mrb[85].mxu1 }
 0x223   :  { %v1268_v37 = vadd.f32 %v3370_v45, %v1267_v34  ;;  %2747 = vmatprep.mubr.msk.f32.mxu0 %vm93_vm0, %v1376_v28 }
 0x224   :  { %2748 = vmatmul.mubr.msk.f32.gmra.mrb[82].mxu0 %vm93_vm0, %v1377_v32  ;;  %v1379_v18 = vmax.f32 %v1273_v33, 0.0 }
 0x225   :  { %v1378_v38 = vmax.f32 %v1268_v37, 0.0  ;;  %v2651_v39 = vpop.f32.mrb[86].mxu1 }
 0x226   :  { %v1283_v46 = vadd.f32 %v2651_v39, %v3370_v45  ;;  %v1277_v26 = vpop.f32.mrb[87].mxu1 }
 0x227   :  { %v1278_v56 = vadd.f32 %v3370_v45, %v1277_v26  ;;  %2750 = vmatprep.mubr.msk.f32.mxu0 %vm93_vm0, %v1378_v38 }
 0x228   :  { %2751 = vmatmul.mubr.msk.f32.gmra.mrb[84].mxu0 %vm93_vm0, %v1379_v18  ;;  %v1381_v51 = vmax.f32 %v1283_v46, 0.0 }
 0x229   :  { %v1380_v41 = vmax.f32 %v1278_v56, 0.0  ;;  %v2654_v2 = vpop.f32.mrb[88].mxu1 }
 0x22a   :  { %v1293_v12 = vadd.f32 %v2654_v2, %v3370_v45  ;;  %v1287_v61 = vpop.f32.mrb[89].mxu1 }
 0x22b   :  { %v1288_v23 = vadd.f32 %v3370_v45, %v1287_v61  ;;  %2753 = vmatprep.mubr.msk.f32.mxu0 %vm93_vm0, %v1380_v41 }
 0x22c   :  { %2754 = vmatmul.mubr.msk.f32.gmra.mrb[86].mxu0 %vm93_vm0, %v1381_v51  ;;  %v1383_v17 = vmax.f32 %v1293_v12, 0.0 }
 0x22d   :  { %v1382_v7 = vmax.f32 %v1288_v23, 0.0  ;;  %v2657_v35 = vpop.f32.mrb[90].mxu1 }
 0x22e   :  { %v1303_v47 = vadd.f32 %v2657_v35, %v3370_v45  ;;  %v1297_v30 = vpop.f32.mrb[91].mxu1 }
 0x22f   :  { %v1298_v59 = vadd.f32 %v3370_v45, %v1297_v30  ;;  %2756 = vmatprep.mubr.msk.f32.mxu0 %vm93_vm0, %v1382_v7 }
 0x230   :  { %2757 = vmatmul.mubr.msk.f32.gmra.mrb[88].mxu0 %vm93_vm0, %v1383_v17  ;;  %v1385_v53 = vmax.f32 %v1303_v47, 0.0 }
 0x231   :  { %v1384_v40 = vmax.f32 %v1298_v59, 0.0  ;;  %v2660_v8 = vpop.f32.mrb[92].mxu1 }
 0x232   :  { %v1313_v21 = vadd.f32 %v2660_v8, %v3370_v45  ;;  %v1307_v1 = vpop.f32.mrb[93].mxu1 }
 0x233   :  { %v1308_v36 = vadd.f32 %v3370_v45, %v1307_v1  ;;  %2759 = vmatprep.mubr.msk.f32.mxu0 %vm93_vm0, %v1384_v40 }
 0x234   :  { %2760 = vmatmul.mubr.msk.f32.gmra.mrb[90].mxu0 %vm93_vm0, %v1385_v53  ;;  %v1387_v29 = vmax.f32 %v1313_v21, 0.0 }
 0x235   :  { %v1386_v14 = vmax.f32 %v1308_v36, 0.0  ;;  %v2663_v42 = vpop.f32.mrb[94].mxu1 }
 0x236   :  { %v1323_v44 = vadd.f32 %v2663_v42, %v3370_v45  ;;  %v1317_v43 = vpop.f32.mrb[95].mxu1 }
 0x237   :  { %v1318_v48 = vadd.f32 %v3370_v45, %v1317_v43  ;;  %2762 = vmatprep.mubr.msk.f32.mxu0 %vm93_vm0, %v1386_v14 }
 0x238   :  { %2763 = vmatmul.mubr.msk.f32.gmra.mrb[92].mxu0 %vm93_vm0, %v1387_v29  ;;  %v1389_v50 = vmax.f32 %v1323_v44, 0.0 }
 0x239   :  { %v1388_v49 = vmax.f32 %v1318_v48, 0.0 }
 0x23b   :  { %2765 = vmatprep.mubr.msk.f32.mxu0 %vm93_vm0, %v1388_v49 }
 0x23c   :  { %2766 = vmatmul.mubr.msk.f32.gmra.mrb[94].mxu0 %vm93_vm0, %v1389_v50 }
 0x293   :  { %v2674_v54 = vpop.f32.mrb[32].mxu0 }
 0x294   :  { %v1663_v55 = vadd.f32 %v2674_v54, %v3503_v52  ;;  %v1657_v45 = vpop.f32.mrb[33].mxu0 }
 0x295   :  { %v1658_v57 = vadd.f32 %v3503_v52, %v1657_v45 }
 0x296   :  { %1978 = vst.msk [vmem:[%s3830_s5 + $0x8] sm:$0xff] %vm1976_vm2, %v1663_v55 }
 0x297   :  { %1977 = vst.msk [vmem:[%s3830_s5] sm:$0xff] %vm1976_vm2, %v1658_v57  ;;  %v2677_v58 = vpop.f32.mrb[34].mxu0 }
 0x298   :  { %v1673_v60 = vadd.f32 %v2677_v58, %v3503_v52  ;;  %v1667_v62 = vpop.f32.mrb[35].mxu0 }
 0x299   :  { %v1668_v63 = vadd.f32 %v3503_v52, %v1667_v62 }
 0x29a   :  { %1980 = vst.msk [vmem:[%s3830_s5 + $0x18] sm:$0xff] %vm1976_vm2, %v1673_v60 }
 0x29b   :  { %1979 = vst.msk [vmem:[%s3830_s5 + $0x10] sm:$0xff] %vm1976_vm2, %v1668_v63  ;;  %v2680_v0 = vpop.f32.mrb[36].mxu0 }
 0x29c   :  { %v1683_v3 = vadd.f32 %v2680_v0, %v3503_v52  ;;  %v1677_v4 = vpop.f32.mrb[37].mxu0 }
 0x29d   :  { %v1678_v5 = vadd.f32 %v3503_v52, %v1677_v4 }
 0x29e   :  { %1982 = vst.msk [vmem:[%s3830_s5 + $0x28] sm:$0xff] %vm1976_vm2, %v1683_v3 }
 0x29f   :  { %1981 = vst.msk [vmem:[%s3830_s5 + $0x20] sm:$0xff] %vm1976_vm2, %v1678_v5  ;;  %v2683_v6 = vpop.f32.mrb[38].mxu0 }
 0x2a0   :  { %v1693_v9 = vadd.f32 %v2683_v6, %v3503_v52  ;;  %v1687_v10 = vpop.f32.mrb[39].mxu0 }
 0x2a1   :  { %v1688_v11 = vadd.f32 %v3503_v52, %v1687_v10 }
 0x2a2   :  { %1984 = vst.msk [vmem:[%s3830_s5 + $0x38] sm:$0xff] %vm1976_vm2, %v1693_v9 }
 0x2a3   :  { %1983 = vst.msk [vmem:[%s3830_s5 + $0x30] sm:$0xff] %vm1976_vm2, %v1688_v11  ;;  %v2686_v13 = vpop.f32.mrb[40].mxu0 }
 0x2a4   :  { %v1703_v15 = vadd.f32 %v2686_v13, %v3503_v52  ;;  %v1697_v16 = vpop.f32.mrb[41].mxu0 }
 0x2a5   :  { %v1698_v19 = vadd.f32 %v3503_v52, %v1697_v16 }
 0x2a6   :  { %1986 = vst.msk [vmem:[%s3830_s5 + $0x48] sm:$0xff] %vm1976_vm2, %v1703_v15 }
 0x2a7   :  { %1985 = vst.msk [vmem:[%s3830_s5 + $0x40] sm:$0xff] %vm1976_vm2, %v1698_v19  ;;  %v2689_v20 = vpop.f32.mrb[42].mxu0 }
 0x2a8   :  { %v1713_v22 = vadd.f32 %v2689_v20, %v3503_v52  ;;  %v1707_v24 = vpop.f32.mrb[43].mxu0 }
 0x2a9   :  { %v1708_v25 = vadd.f32 %v3503_v52, %v1707_v24 }
 0x2aa   :  { %1988 = vst.msk [vmem:[%s3830_s5 + $0x58] sm:$0xff] %vm1976_vm2, %v1713_v22 }
 0x2ab   :  { %1987 = vst.msk [vmem:[%s3830_s5 + $0x50] sm:$0xff] %vm1976_vm2, %v1708_v25  ;;  %v2692_v27 = vpop.f32.mrb[44].mxu0 }
 0x2ac   :  { %v1723_v28 = vadd.f32 %v2692_v27, %v3503_v52  ;;  %v1717_v31 = vpop.f32.mrb[45].mxu0 }
 0x2ad   :  { %v1718_v32 = vadd.f32 %v3503_v52, %v1717_v31 }
 0x2ae   :  { %1990 = vst.msk [vmem:[%s3830_s5 + $0x68] sm:$0xff] %vm1976_vm2, %v1723_v28 }
 0x2af   :  { %1989 = vst.msk [vmem:[%s3830_s5 + $0x60] sm:$0xff] %vm1976_vm2, %v1718_v32  ;;  %v2695_v33 = vpop.f32.mrb[46].mxu0 }
 0x2b0   :  { %v1733_v34 = vadd.f32 %v2695_v33, %v3503_v52  ;;  %v1727_v37 = vpop.f32.mrb[47].mxu0 }
 0x2b1   :  { %v1728_v38 = vadd.f32 %v3503_v52, %v1727_v37 }
 0x2b2   :  { %1992 = vst.msk [vmem:[%s3830_s5 + $0x78] sm:$0xff] %vm1976_vm2, %v1733_v34 }
 0x2b3   :  { %1991 = vst.msk [vmem:[%s3830_s5 + $0x70] sm:$0xff] %vm1976_vm2, %v1728_v38  ;;  %v2698_v39 = vpop.f32.mrb[48].mxu0 }
 0x2b4   :  { %v1743_v18 = vadd.f32 %v2698_v39, %v3503_v52  ;;  %v1737_v46 = vpop.f32.mrb[49].mxu0 }
 0x2b5   :  { %v1738_v26 = vadd.f32 %v3503_v52, %v1737_v46 }
 0x2b6   :  { %1994 = vst.msk [vmem:[%s3830_s5 + $0x88] sm:$0xff] %vm1976_vm2, %v1743_v18 }
 0x2b7   :  { %1993 = vst.msk [vmem:[%s3830_s5 + $0x80] sm:$0xff] %vm1976_vm2, %v1738_v26  ;;  %v2701_v56 = vpop.f32.mrb[50].mxu0 }
 0x2b8   :  { %v1753_v41 = vadd.f32 %v2701_v56, %v3503_v52  ;;  %v1747_v2 = vpop.f32.mrb[51].mxu0 }
 0x2b9   :  { %v1748_v51 = vadd.f32 %v3503_v52, %v1747_v2 }
 0x2ba   :  { %1996 = vst.msk [vmem:[%s3830_s5 + $0x98] sm:$0xff] %vm1976_vm2, %v1753_v41 }
 0x2bb   :  { %1995 = vst.msk [vmem:[%s3830_s5 + $0x90] sm:$0xff] %vm1976_vm2, %v1748_v51  ;;  %v2704_v12 = vpop.f32.mrb[52].mxu0 }
 0x2bc   :  { %v1763_v61 = vadd.f32 %v2704_v12, %v3503_v52  ;;  %v1757_v23 = vpop.f32.mrb[53].mxu0 }
 0x2bd   :  { %v1758_v7 = vadd.f32 %v3503_v52, %v1757_v23 }
 0x2be   :  { %1998 = vst.msk [vmem:[%s3830_s5 + $0xa8] sm:$0xff] %vm1976_vm2, %v1763_v61 }
 0x2bf   :  { %1997 = vst.msk [vmem:[%s3830_s5 + $0xa0] sm:$0xff] %vm1976_vm2, %v1758_v7  ;;  %v2707_v35 = vpop.f32.mrb[54].mxu0 }
 0x2c0   :  { %v1773_v17 = vadd.f32 %v2707_v35, %v3503_v52  ;;  %v1767_v47 = vpop.f32.mrb[55].mxu0 }
 0x2c1   :  { %v1768_v30 = vadd.f32 %v3503_v52, %v1767_v47 }
 0x2c2   :  { %2000 = vst.msk [vmem:[%s3830_s5 + $0xb8] sm:$0xff] %vm1976_vm2, %v1773_v17 }
 0x2c3   :  { %1999 = vst.msk [vmem:[%s3830_s5 + $0xb0] sm:$0xff] %vm1976_vm2, %v1768_v30  ;;  %v2710_v59 = vpop.f32.mrb[56].mxu0 }
 0x2c4   :  { %v1783_v40 = vadd.f32 %v2710_v59, %v3503_v52  ;;  %v1777_v8 = vpop.f32.mrb[57].mxu0 }
 0x2c5   :  { %v1778_v53 = vadd.f32 %v3503_v52, %v1777_v8 }
 0x2c6   :  { %2002 = vst.msk [vmem:[%s3830_s5 + $0xc8] sm:$0xff] %vm1976_vm2, %v1783_v40 }
 0x2c7   :  { %2001 = vst.msk [vmem:[%s3830_s5 + $0xc0] sm:$0xff] %vm1976_vm2, %v1778_v53  ;;  %v2713_v21 = vpop.f32.mrb[58].mxu0 }
 0x2c8   :  { %v1793_v1 = vadd.f32 %v2713_v21, %v3503_v52  ;;  %v1787_v36 = vpop.f32.mrb[59].mxu0 }
 0x2c9   :  { %v1788_v14 = vadd.f32 %v3503_v52, %v1787_v36 }
 0x2ca   :  { %2004 = vst.msk [vmem:[%s3830_s5 + $0xd8] sm:$0xff] %vm1976_vm2, %v1793_v1 }
 0x2cb   :  { %2003 = vst.msk [vmem:[%s3830_s5 + $0xd0] sm:$0xff] %vm1976_vm2, %v1788_v14  ;;  %v2716_v42 = vpop.f32.mrb[60].mxu0 }
 0x2cc   :  { %v1803_v29 = vadd.f32 %v2716_v42, %v3503_v52  ;;  %v1797_v44 = vpop.f32.mrb[61].mxu0 }
 0x2cd   :  { %v1798_v43 = vadd.f32 %v3503_v52, %v1797_v44 }
 0x2ce   :  { %2006 = vst.msk [vmem:[%s3830_s5 + $0xe8] sm:$0xff] %vm1976_vm2, %v1803_v29 }
 0x2cf   :  { %2005 = vst.msk [vmem:[%s3830_s5 + $0xe0] sm:$0xff] %vm1976_vm2, %v1798_v43  ;;  %v2719_v48 = vpop.f32.mrb[62].mxu0 }
 0x2d0   :  { %v1813_v49 = vadd.f32 %v2719_v48, %v3503_v52  ;;  %v1807_v50 = vpop.f32.mrb[63].mxu0 }
 0x2d1   :  { %v1808_v54 = vadd.f32 %v3503_v52, %v1807_v50 }
 0x2d2   :  { %2008 = vst.msk [vmem:[%s3830_s5 + $0xf8] sm:$0xff] %vm1976_vm2, %v1813_v49 }
 0x2d3   :  { %2007 = vst.msk [vmem:[%s3830_s5 + $0xf0] sm:$0xff] %vm1976_vm2, %v1808_v54  ;;  %v2722_v55 = vpop.f32.mrb[64].mxu0 }
 0x2d4   :  { %v1823_v45 = vadd.f32 %v2722_v55, %v3503_v52  ;;  %v1817_v57 = vpop.f32.mrb[65].mxu0 }
 0x2d5   :  { %v1818_v58 = vadd.f32 %v3503_v52, %v1817_v57 }
 0x2d6   :  { %2010 = vst.msk [vmem:[%s3830_s5 + $0x108] sm:$0xff] %vm1976_vm2, %v1823_v45 }
 0x2d7   :  { %2009 = vst.msk [vmem:[%s3830_s5 + $0x100] sm:$0xff] %vm1976_vm2, %v1818_v58  ;;  %v2725_v60 = vpop.f32.mrb[66].mxu0 }
 0x2d8   :  { %v1833_v62 = vadd.f32 %v2725_v60, %v3503_v52  ;;  %v1827_v63 = vpop.f32.mrb[67].mxu0 }
 0x2d9   :  { %v1828_v0 = vadd.f32 %v3503_v52, %v1827_v63 }
 0x2da   :  { %2012 = vst.msk [vmem:[%s3830_s5 + $0x118] sm:$0xff] %vm1976_vm2, %v1833_v62 }
 0x2db   :  { %2011 = vst.msk [vmem:[%s3830_s5 + $0x110] sm:$0xff] %vm1976_vm2, %v1828_v0  ;;  %v2728_v3 = vpop.f32.mrb[68].mxu0 }
 0x2dc   :  { %v1843_v4 = vadd.f32 %v2728_v3, %v3503_v52  ;;  %v1837_v5 = vpop.f32.mrb[69].mxu0 }
 0x2dd   :  { %v1838_v6 = vadd.f32 %v3503_v52, %v1837_v5 }
 0x2de   :  { %2014 = vst.msk [vmem:[%s3830_s5 + $0x128] sm:$0xff] %vm1976_vm2, %v1843_v4 }
 0x2df   :  { %2013 = vst.msk [vmem:[%s3830_s5 + $0x120] sm:$0xff] %vm1976_vm2, %v1838_v6  ;;  %v2731_v9 = vpop.f32.mrb[70].mxu0 }
 0x2e0   :  { %v1853_v10 = vadd.f32 %v2731_v9, %v3503_v52  ;;  %v1847_v11 = vpop.f32.mrb[71].mxu0 }
 0x2e1   :  { %v1848_v13 = vadd.f32 %v3503_v52, %v1847_v11 }
 0x2e2   :  { %2016 = vst.msk [vmem:[%s3830_s5 + $0x138] sm:$0xff] %vm1976_vm2, %v1853_v10 }
 0x2e3   :  { %2015 = vst.msk [vmem:[%s3830_s5 + $0x130] sm:$0xff] %vm1976_vm2, %v1848_v13  ;;  %v2734_v15 = vpop.f32.mrb[72].mxu0 }
 0x2e4   :  { %v1863_v16 = vadd.f32 %v2734_v15, %v3503_v52  ;;  %v1857_v19 = vpop.f32.mrb[73].mxu0 }
 0x2e5   :  { %v1858_v20 = vadd.f32 %v3503_v52, %v1857_v19 }
 0x2e6   :  { %2018 = vst.msk [vmem:[%s3830_s5 + $0x148] sm:$0xff] %vm1976_vm2, %v1863_v16 }
 0x2e7   :  { %2017 = vst.msk [vmem:[%s3830_s5 + $0x140] sm:$0xff] %vm1976_vm2, %v1858_v20  ;;  %v2737_v22 = vpop.f32.mrb[74].mxu0 }
 0x2e8   :  { %v1873_v24 = vadd.f32 %v2737_v22, %v3503_v52  ;;  %v1867_v25 = vpop.f32.mrb[75].mxu0 }
 0x2e9   :  { %v1868_v27 = vadd.f32 %v3503_v52, %v1867_v25 }
 0x2ea   :  { %2020 = vst.msk [vmem:[%s3830_s5 + $0x158] sm:$0xff] %vm1976_vm2, %v1873_v24 }
 0x2eb   :  { %2019 = vst.msk [vmem:[%s3830_s5 + $0x150] sm:$0xff] %vm1976_vm2, %v1868_v27  ;;  %v2740_v28 = vpop.f32.mrb[76].mxu0 }
 0x2ec   :  { %v1883_v31 = vadd.f32 %v2740_v28, %v3503_v52  ;;  %v1877_v32 = vpop.f32.mrb[77].mxu0 }
 0x2ed   :  { %v1878_v33 = vadd.f32 %v3503_v52, %v1877_v32 }
 0x2ee   :  { %2022 = vst.msk [vmem:[%s3830_s5 + $0x168] sm:$0xff] %vm1976_vm2, %v1883_v31 }
 0x2ef   :  { %2021 = vst.msk [vmem:[%s3830_s5 + $0x160] sm:$0xff] %vm1976_vm2, %v1878_v33  ;;  %v2743_v34 = vpop.f32.mrb[78].mxu0 }
 0x2f0   :  { %v1893_v37 = vadd.f32 %v2743_v34, %v3503_v52  ;;  %v1887_v38 = vpop.f32.mrb[79].mxu0 }
 0x2f1   :  { %v1888_v39 = vadd.f32 %v3503_v52, %v1887_v38 }
 0x2f2   :  { %2024 = vst.msk [vmem:[%s3830_s5 + $0x178] sm:$0xff] %vm1976_vm2, %v1893_v37 }
 0x2f3   :  { %2023 = vst.msk [vmem:[%s3830_s5 + $0x170] sm:$0xff] %vm1976_vm2, %v1888_v39  ;;  %v2746_v18 = vpop.f32.mrb[80].mxu0 }
 0x2f4   :  { %v1903_v46 = vadd.f32 %v2746_v18, %v3503_v52  ;;  %v1897_v26 = vpop.f32.mrb[81].mxu0 }
 0x2f5   :  { %v1898_v56 = vadd.f32 %v3503_v52, %v1897_v26 }
 0x2f6   :  { %2026 = vst.msk [vmem:[%s3830_s5 + $0x188] sm:$0xff] %vm1976_vm2, %v1903_v46 }
 0x2f7   :  { %2025 = vst.msk [vmem:[%s3830_s5 + $0x180] sm:$0xff] %vm1976_vm2, %v1898_v56  ;;  %v2749_v41 = vpop.f32.mrb[82].mxu0 }
 0x2f8   :  { %v1913_v2 = vadd.f32 %v2749_v41, %v3503_v52  ;;  %v1907_v51 = vpop.f32.mrb[83].mxu0 }
 0x2f9   :  { %v1908_v12 = vadd.f32 %v3503_v52, %v1907_v51 }
 0x2fa   :  { %2028 = vst.msk [vmem:[%s3830_s5 + $0x198] sm:$0xff] %vm1976_vm2, %v1913_v2 }
 0x2fb   :  { %2027 = vst.msk [vmem:[%s3830_s5 + $0x190] sm:$0xff] %vm1976_vm2, %v1908_v12  ;;  %v2752_v61 = vpop.f32.mrb[84].mxu0 }
 0x2fc   :  { %v1923_v23 = vadd.f32 %v2752_v61, %v3503_v52  ;;  %v1917_v7 = vpop.f32.mrb[85].mxu0 }
 0x2fd   :  { %v1918_v35 = vadd.f32 %v3503_v52, %v1917_v7 }
 0x2fe   :  { %2030 = vst.msk [vmem:[%s3830_s5 + $0x1a8] sm:$0xff] %vm1976_vm2, %v1923_v23 }
 0x2ff   :  { %2029 = vst.msk [vmem:[%s3830_s5 + $0x1a0] sm:$0xff] %vm1976_vm2, %v1918_v35  ;;  %v2755_v17 = vpop.f32.mrb[86].mxu0 }
 0x300   :  { %v1933_v47 = vadd.f32 %v2755_v17, %v3503_v52  ;;  %v1927_v30 = vpop.f32.mrb[87].mxu0 }
 0x301   :  { %v1928_v59 = vadd.f32 %v3503_v52, %v1927_v30 }
 0x302   :  { %2032 = vst.msk [vmem:[%s3830_s5 + $0x1b8] sm:$0xff] %vm1976_vm2, %v1933_v47 }
 0x303   :  { %2031 = vst.msk [vmem:[%s3830_s5 + $0x1b0] sm:$0xff] %vm1976_vm2, %v1928_v59  ;;  %v2758_v40 = vpop.f32.mrb[88].mxu0 }
 0x304   :  { %v1943_v8 = vadd.f32 %v2758_v40, %v3503_v52  ;;  %v1937_v53 = vpop.f32.mrb[89].mxu0 }
 0x305   :  { %v1938_v21 = vadd.f32 %v3503_v52, %v1937_v53 }
 0x306   :  { %2034 = vst.msk [vmem:[%s3830_s5 + $0x1c8] sm:$0xff] %vm1976_vm2, %v1943_v8 }
 0x307   :  { %2033 = vst.msk [vmem:[%s3830_s5 + $0x1c0] sm:$0xff] %vm1976_vm2, %v1938_v21  ;;  %v2761_v1 = vpop.f32.mrb[90].mxu0 }
 0x308   :  { %v1953_v36 = vadd.f32 %v2761_v1, %v3503_v52  ;;  %v1947_v14 = vpop.f32.mrb[91].mxu0 }
 0x309   :  { %v1948_v42 = vadd.f32 %v3503_v52, %v1947_v14 }
 0x30a   :  { %2036 = vst.msk [vmem:[%s3830_s5 + $0x1d8] sm:$0xff] %vm1976_vm2, %v1953_v36 }
 0x30b   :  { %2035 = vst.msk [vmem:[%s3830_s5 + $0x1d0] sm:$0xff] %vm1976_vm2, %v1948_v42  ;;  %v2764_v29 = vpop.f32.mrb[92].mxu0 }
 0x30c   :  { %v1963_v44 = vadd.f32 %v2764_v29, %v3503_v52  ;;  %v1957_v43 = vpop.f32.mrb[93].mxu0 }
 0x30d   :  { %v1958_v48 = vadd.f32 %v3503_v52, %v1957_v43 }
 0x30e   :  { %2038 = vst.msk [vmem:[%s3830_s5 + $0x1e8] sm:$0xff] %vm1976_vm2, %v1963_v44 }
 0x30f   :  { %2037 = vst.msk [vmem:[%s3830_s5 + $0x1e0] sm:$0xff] %vm1976_vm2, %v1958_v48  ;;  %v2767_v49 = vpop.f32.mrb[94].mxu0 }
 0x310   :  { %v1973_v50 = vadd.f32 %v2767_v49, %v3503_v52  ;;  %v1967_v54 = vpop.f32.mrb[95].mxu0 }
 0x311   :  { %v1968_v55 = vadd.f32 %v3503_v52, %v1967_v54 }
 0x312   :  { %2040 = vst.msk [vmem:[%s3830_s5 + $0x1f8] sm:$0xff] %vm1976_vm2, %v1973_v50 }
 0x313   :  { %2039 = vst.msk [vmem:[%s3830_s5 + $0x1f0] sm:$0xff] %vm1976_vm2, %v1968_v55 }

</bundles_post_ra>
